<compile_context>
chip_gen: v7x
topology: tpu7x:2x2x1
jax: 0.10.0
libtpu: 0.0.40
codegen_flags: <defaults>
</compile_context>

<pallas_src>
import jax
import jax.numpy as jnp
from jax.experimental import pallas as pl
from jax.experimental.pallas import tpu as pltpu

# bf16 on the MXU path (f32 accumulate + f32 gate math) per the perf review.
# Set to jnp.float32 for bit-tight comparison against the f32 reference.
MATMUL_DTYPE = jnp.bfloat16

# Time-chunked layers keep per-chunk VMEM bounded, so a conservative 32 MiB scoped
# limit is safe on v5e/v6e/v7x.  If you revert to a fully-resident layer on v5e/v6e,
# raise this toward 64-96 MiB (physical VMEM there is 128 MiB); keep <= 48 MiB on v7x.
VMEM_LIMIT_BYTES = 32 * 1024 * 1024


def _round_up(x, m):
    return ((x + m - 1) // m) * m


def _choose_time_chunk(S, BP, max_rows=256):
    """Largest divisor Tt of S with Tt*BP rows per chunk staying under max_rows.

    Bounds the per-chunk gx scratch / x / y footprint so VMEM stays O(Tt) even for
    long sequences and large nhid (v7x: 64 MiB VMEM)."""
    best = 1
    for t in range(1, S + 1):
        if S % t == 0 and t * BP <= max_rows:
            best = t
    return best


# ----------------------------- LSTM layer kernel ----------------------------- #
def _lstm_layer_kernel(x_ref, h0_ref, c0_ref, wih_ref, whh_ref, b_ref,
                       y_ref, hN_ref, cN_ref, gx_scr, h_scr, c_scr):
    """One time-chunk of an LSTM layer.

    x_ref   : (Tt*BP, IN)   time-major rows of this chunk (row = t*BP + b), bf16
    h0/c0   : (BP, NH)      initial states, f32
    wih_ref : (IN, 4*NH)    padded W_ih^T, bf16 (gate g at lanes [g*NH, (g+1)*NH))
    whh_ref : (NH, 4*NH)    padded W_hh^T, bf16
    b_ref   : (1, 4*NH)     b_ih + b_hh, f32
    y_ref   : (Tt*BP, NH)   per-step hidden states of this chunk, bf16
    hN/cN   : (BP, NH)      final states, f32 (constant-index blocks, written once to HBM)
    gx_scr  : VMEM (Tt*BP, 4*NH) f32 — hoisted input projection for this chunk
    h_scr/c_scr : VMEM (BP, NH) f32 — recurrent carry, persists across grid steps
    """
    BP, NH = h0_ref.shape
    Tt = x_ref.shape[0] // BP
    chunk = pl.program_id(0)

    @pl.when(chunk == 0)
    def _():
        h_scr[...] = h0_ref[...]
        c_scr[...] = c0_ref[...]

    # (1) Hoisted input projection: one MXU matmul over the whole chunk (bf16 in,
    #     f32 accumulate), bias fused in f32.
    gx_scr[...] = (jnp.dot(x_ref[...], wih_ref[...],
                           preferred_element_type=jnp.float32)
                   + b_ref[...])

    w_hh = whh_ref[...]

    # (2) Sequential recurrence over the chunk's timesteps.
    # TODO(synk): h @ W_hh has only BP rows on the MXU; if the real batch is larger
    # keep it in BP, or stack independent sequences to fill MXU sublanes.
    def step(i, carry):
        h, c = carry
        row = pl.multiple_of(i * BP, BP)          # sublane-aligned dynamic offset
        gates = gx_scr[pl.ds(row, BP), :] + jnp.dot(
            h.astype(w_hh.dtype), w_hh, preferred_element_type=jnp.float32)
        # PyTorch gate order i, f, g, o; each slice is a full 128-lane block.
        ig = jax.nn.sigmoid(gates[:, 0 * NH:1 * NH])
        fg = jax.nn.sigmoid(gates[:, 1 * NH:2 * NH])
        gg = jnp.tanh(gates[:, 2 * NH:3 * NH])
        og = jax.nn.sigmoid(gates[:, 3 * NH:4 * NH])
        c_new = fg * c + ig * gg                  # f32 elementwise (v5e-safe)
        h_new = og * jnp.tanh(c_new)
        y_ref[pl.ds(row, BP), :] = h_new.astype(y_ref.dtype)
        return h_new, c_new

    h_fin, c_fin = jax.lax.fori_loop(0, Tt, step, (h_scr[...], c_scr[...]),
                                     unroll=min(Tt, 8))
    h_scr[...] = h_fin
    c_scr[...] = c_fin
    # Constant-index output blocks: VMEM writes per chunk, single HBM writeback.
    hN_ref[...] = h_fin.astype(hN_ref.dtype)
    cN_ref[...] = c_fin.astype(cN_ref.dtype)


def lstm_layer(x2d, h0, c0, w_ih_t, w_hh_t, b):
    """x2d: (S*BP, IN) time-major padded bf16 input.  Returns (y2d bf16, h_N, c_N)."""
    SB, IN = x2d.shape
    BP, NH = h0.shape
    S = SB // BP
    Tt = _choose_time_chunk(S, BP)
    n_chunks = S // Tt
    rows = Tt * BP
    return pl.pallas_call(
        _lstm_layer_kernel,
        grid=(n_chunks,),
        in_specs=[
            pl.BlockSpec((rows, IN), lambda t: (t, 0)),       # x (time-tiled)
            pl.BlockSpec((BP, NH), lambda t: (0, 0)),         # h0 (resident)
            pl.BlockSpec((BP, NH), lambda t: (0, 0)),         # c0 (resident)
            pl.BlockSpec((IN, 4 * NH), lambda t: (0, 0)),     # W_ih^T (resident)
            pl.BlockSpec((NH, 4 * NH), lambda t: (0, 0)),     # W_hh^T (resident)
            pl.BlockSpec((1, 4 * NH), lambda t: (0, 0)),      # bias   (resident)
        ],
        out_specs=[
            pl.BlockSpec((rows, NH), lambda t: (t, 0)),       # per-step h (time-tiled)
            pl.BlockSpec((BP, NH), lambda t: (0, 0)),         # final h
            pl.BlockSpec((BP, NH), lambda t: (0, 0)),         # final c
        ],
        out_shape=[
            jax.ShapeDtypeStruct((SB, NH), MATMUL_DTYPE),
            jax.ShapeDtypeStruct((BP, NH), jnp.float32),
            jax.ShapeDtypeStruct((BP, NH), jnp.float32),
        ],
        scratch_shapes=[pltpu.VMEM((rows, 4 * NH), jnp.float32),   # gx (per chunk)
                        pltpu.VMEM((BP, NH), jnp.float32),         # h carry
                        pltpu.VMEM((BP, NH), jnp.float32)],        # c carry
        compiler_params=pltpu.CompilerParams(
            dimension_semantics=("arbitrary",),                # sequential recurrence
            vmem_limit_bytes=VMEM_LIMIT_BYTES),
    )(x2d, h0, c0, w_ih_t, w_hh_t, b)


# ------------------------------ Decoder kernel ------------------------------ #
def _decoder_kernel(x_ref, w_ref, o_ref):
    o_ref[...] = jnp.dot(x_ref[...], w_ref[...],
                         preferred_element_type=jnp.float32).astype(o_ref.dtype)


def decoder_matmul(x, w_t):
    """Tiled, lane-dense decoder matmul.  x: (M, K) bf16, w_t: (K, N) bf16 -> (M, N) f32.
    M is a multiple of 8, N a multiple of 128 (padded by the caller)."""
    M, K = x.shape
    N = w_t.shape[1]
    tm = 256 if M % 256 == 0 else M
    tn = 512 if N % 512 == 0 else (256 if N % 256 == 0 else 128)
    # Grid ordered (vocab tile, row tile): the row axis is the fast axis, so the
    # streamed (K, tn) weight block is fetched once per vocab tile and reused across
    # all row tiles (decoder is weight-bandwidth bound for small B*S).
    # TODO(synk): tile K (reduction axis + VMEM accumulator) once nhid is large
    # enough that a full-K block stresses VMEM.
    return pl.pallas_call(
        _decoder_kernel,
        grid=(N // tn, M // tm),
        in_specs=[pl.BlockSpec((tm, K), lambda j, i: (i, 0)),
                  pl.BlockSpec((K, tn), lambda j, i: (0, j))],
        out_specs=pl.BlockSpec((tm, tn), lambda j, i: (i, j)),
        out_shape=jax.ShapeDtypeStruct((M, N), jnp.float32),
        compiler_params=pltpu.CompilerParams(
            dimension_semantics=("parallel", "parallel"),
            vmem_limit_bytes=VMEM_LIMIT_BYTES),
    )(x, w_t)


# --------------------------- One-time weight packing -------------------------- #
def _pad_gate_weight_t(w, nhid, NH, in_dim, IN):
    """(4*nhid, in_dim) PyTorch LSTM weight -> (IN, 4*NH) transposed & zero-padded
    so gate g occupies lanes [g*NH, (g+1)*NH)."""
    w4 = w.reshape(4, nhid, in_dim)
    w4 = jnp.pad(w4, ((0, 0), (0, NH - nhid), (0, IN - in_dim)))
    return jnp.transpose(w4, (2, 0, 1)).reshape(IN, 4 * NH)


def _pad_gate_bias(b, nhid, NH):
    b4 = jnp.pad(b.reshape(4, nhid), ((0, 0), (0, NH - nhid)))
    return b4.reshape(1, 4 * NH)


def pack_params(params):
    """Pack/pad/transpose all weights ONCE (outside the per-call forward)."""
    ntoken, ninp = params["encoder"].shape
    nhid = params["lstm"][0][1].shape[1]           # w_hh: (4*nhid, nhid)
    NH = _round_up(nhid, 128)                      # hidden lanes (per-gate slice)
    NI = _round_up(ninp, 128)                      # embedding lanes
    NTOK = _round_up(ntoken, 128)                  # decoder vocab lanes

    packed = {
        # Like the PyTorch module, init_weights() overwrites the padding row too,
        # so the forward is a plain gather (padding_idx only affects gradients).
        "encoder": jnp.pad(params["encoder"],
                           ((0, 0), (0, NI - ninp))).astype(MATMUL_DTYPE),
        "dec_w_t": jnp.pad(params["decoder"].T,
                           ((0, NH - nhid), (0, NTOK - ntoken))).astype(MATMUL_DTYPE),
        "lstm": [],
        "dims": {"ntoken": ntoken, "ninp": ninp, "nhid": nhid,
                 "NI": NI, "NH": NH, "NTOK": NTOK},
    }
    for l, (w_ih, w_hh, b_ih, b_hh) in enumerate(params["lstm"]):
        in_dim = w_ih.shape[1]
        IN = NI if l == 0 else NH
        packed["lstm"].append({
            "wih_t": _pad_gate_weight_t(w_ih, nhid, NH, in_dim, IN).astype(MATMUL_DTYPE),
            "whh_t": _pad_gate_weight_t(w_hh, nhid, NH, nhid, NH).astype(MATMUL_DTYPE),
            "b": _pad_gate_bias(b_ih + b_hh, nhid, NH),          # f32
        })
    return packed


# ------------------------------ Parameter init ------------------------------ #
def init_params(key, ntoken, ninp, nhid, nlayers):
    initrange = 0.1
    keys = jax.random.split(key, 2 + 4 * nlayers)
    params = {
        "encoder": jax.random.uniform(keys[0], (ntoken, ninp), jnp.float32,
                                      -initrange, initrange),
        "decoder": jax.random.uniform(keys[1], (ntoken, nhid), jnp.float32,
                                      -initrange, initrange),
    }
    k = 1.0 / (nhid ** 0.5)   # PyTorch LSTM default init range
    layers = []
    for l in range(nlayers):
        in_dim = ninp if l == 0 else nhid
        kk = keys[2 + 4 * l: 2 + 4 * (l + 1)]
        w_ih = jax.random.uniform(kk[0], (4 * nhid, in_dim), jnp.float32, -k, k)
        w_hh = jax.random.uniform(kk[1], (4 * nhid, nhid), jnp.float32, -k, k)
        b_ih = jax.random.uniform(kk[2], (4 * nhid,), jnp.float32, -k, k)
        b_hh = jax.random.uniform(kk[3], (4 * nhid,), jnp.float32, -k, k)
        layers.append((w_ih, w_hh, b_ih, b_hh))
    params["lstm"] = layers
    return params


# --------------------------------- Forward ---------------------------------- #
def forward(packed, tokens, hidden):
    """tokens: (B, S) int32, hidden: (h0, c0) each (nlayers, B, nhid).
    Returns (decoded (B*S, ntoken) f32, (h_n, c_n))."""
    h0, c0 = hidden
    B, S = tokens.shape
    d = packed["dims"]
    ntoken, nhid = d["ntoken"], d["nhid"]
    NI, NH = d["NI"], d["NH"]
    BP = _round_up(B, 8)           # batch sublanes

    # ---- embedding lookup (XLA glue), gathered directly in time-major order ----
    # TODO(synk): fuse this gather into the layer-0 kernel via
    # PrefetchScalarGridSpec(num_scalar_prefetch=1) + pl.Element row indexing.
    emb_tm = packed["encoder"][tokens.T]                          # (S, B, NI) bf16
    emb_tm = jnp.pad(emb_tm, ((0, 0), (0, BP - B), (0, 0)))       # (S, BP, NI)
    x2d = emb_tm.reshape(S * BP, NI)                              # time-major rows

    h_n, c_n = [], []
    for l, layer in enumerate(packed["lstm"]):
        h0p = jnp.pad(h0[l], ((0, BP - B), (0, NH - nhid)))
        c0p = jnp.pad(c0[l], ((0, BP - B), (0, NH - nhid)))
        x2d, hN, cN = lstm_layer(x2d, h0p, c0p,
                                 layer["wih_t"], layer["whh_t"], layer["b"])
        h_n.append(hN[:B, :nhid])
        c_n.append(cN[:B, :nhid])

    # ---- reorder time-major hidden states -> batch_first rows (b*S + t) ----
    # Done on the small nhid-wide bf16 tensor, before the vocab-wide decoder output.
    # TODO(synk): fold this pass into the decoder via a strided (S, 1, NH) in_spec
    # over a (B, NTOK//tn) grid instead of an XLA transpose.
    out = x2d.reshape(S, BP, NH)[:, :B, :]
    out = jnp.transpose(out, (1, 0, 2)).reshape(B * S, NH)        # (B*S, NH) bf16
    MP = _round_up(B * S, 8)
    if MP != B * S:
        out = jnp.pad(out, ((0, MP - B * S), (0, 0)))

    decoded = decoder_matmul(out, packed["dec_w_t"])[:B * S, :ntoken]
    return decoded, (jnp.stack(h_n), jnp.stack(c_n))


# --------------------------- Pure-JAX reference ------------------------------ #
def reference_forward(params, tokens, hidden):
    P = jax.lax.Precision.HIGHEST
    h0, c0 = hidden
    x = params["encoder"][tokens]
    h_list, c_list = [], []
    for l, (w_ih, w_hh, b_ih, b_hh) in enumerate(params["lstm"]):
        def step(carry, xt, w_ih=w_ih, w_hh=w_hh, b_ih=b_ih, b_hh=b_hh):
            h, c = carry
            gates = (jnp.dot(xt, w_ih.T, precision=P) + b_ih
                     + jnp.dot(h, w_hh.T, precision=P) + b_hh)
            nh = h.shape[-1]
            i = jax.nn.sigmoid(gates[:, :nh])
            f = jax.nn.sigmoid(gates[:, nh:2 * nh])
            g = jnp.tanh(gates[:, 2 * nh:3 * nh])
            o = jax.nn.sigmoid(gates[:, 3 * nh:])
            c = f * c + i * g
            h = o * jnp.tanh(c)
            return (h, c), h
        (hN, cN), ys = jax.lax.scan(step, (h0[l], c0[l]),
                                    jnp.transpose(x, (1, 0, 2)))
        x = jnp.transpose(ys, (1, 0, 2))
        h_list.append(hN)
        c_list.append(cN)
    decoded = jnp.dot(x.reshape(-1, x.shape[-1]), params["decoder"].T, precision=P)
    return decoded, (jnp.stack(h_list), jnp.stack(c_list))


if __name__ == "__main__":
    ntoken, ninp, nhid, nlayers = 50, 16, 32, 2
    batch, seq = 2, 8

    key = jax.random.PRNGKey(0)
    pkey, tkey = jax.random.split(key)
    params = init_params(pkey, ntoken, ninp, nhid, nlayers)
    packed = pack_params(params)   # one-time weight packing (not per call)

    tokens = jax.random.randint(tkey, (batch, seq), 0, ntoken, dtype=jnp.int32)
    hidden = (jnp.zeros((nlayers, batch, nhid), jnp.float32),
              jnp.zeros((nlayers, batch, nhid), jnp.float32))

    decoded, (h_n, c_n) = forward(packed, tokens, hidden)
    jax.block_until_ready((decoded, h_n, c_n))

    # sanity check vs pure-f32 JAX reference (kernel matmuls run in bf16 -> loosened tol)
    ref_decoded, (ref_h, ref_c) = reference_forward(params, tokens, hidden)
    assert decoded.shape == (batch * seq, ntoken)
    assert h_n.shape == (nlayers, batch, nhid) and c_n.shape == (nlayers, batch, nhid)
    assert jnp.allclose(decoded, ref_decoded, rtol=3e-2, atol=2e-2)
    assert jnp.allclose(h_n, ref_h, rtol=3e-2, atol=2e-2)
    assert jnp.allclose(c_n, ref_c, rtol=3e-2, atol=2e-2)

    print("KERNEL_OK")
</pallas_src>

<mosaic_0001>
module attributes {stable_mosaic.version = 11 : i64} {
  func.func @_lstm_layer_kernel(%arg0: i32, %arg1: memref<64x128xbf16, #tpu.memory_space<vmem>>, %arg2: memref<8x128xf32, #tpu.memory_space<vmem>>, %arg3: memref<8x128xf32, #tpu.memory_space<vmem>>, %arg4: memref<128x512xbf16, #tpu.memory_space<vmem>>, %arg5: memref<128x512xbf16, #tpu.memory_space<vmem>>, %arg6: memref<1x512xf32, #tpu.memory_space<vmem>>, %arg7: memref<64x128xbf16, #tpu.memory_space<vmem>>, %arg8: memref<8x128xf32, #tpu.memory_space<vmem>>, %arg9: memref<8x128xf32, #tpu.memory_space<vmem>>, %arg10: memref<64x512xf32, #tpu.memory_space<vmem>>, %arg11: memref<8x128xf32, #tpu.memory_space<vmem>>, %arg12: memref<8x128xf32, #tpu.memory_space<vmem>>) attributes {dimension_semantics = [#tpu.dimension_semantics<arbitrary>], iteration_bounds = array<i64: 1>, scalar_prefetch = 0 : i64, scratch_operands = 3 : i64, tpu.core_type = #tpu.core_type<tc>, window_params = [{transform_indices = @transform_0, window_bounds = array<i64: 64, 128>}, {pipeline_mode = #tpu.pipeline_mode<synchronous>, transform_indices = @transform_1, window_bounds = array<i64: 8, 128>}, {pipeline_mode = #tpu.pipeline_mode<synchronous>, transform_indices = @transform_2, window_bounds = array<i64: 8, 128>}, {pipeline_mode = #tpu.pipeline_mode<synchronous>, transform_indices = @transform_3, window_bounds = array<i64: 128, 512>}, {pipeline_mode = #tpu.pipeline_mode<synchronous>, transform_indices = @transform_4, window_bounds = array<i64: 128, 512>}, {pipeline_mode = #tpu.pipeline_mode<synchronous>, transform_indices = @transform_5, window_bounds = array<i64: 1, 512>}, {transform_indices = @transform_6, window_bounds = array<i64: 64, 128>}, {pipeline_mode = #tpu.pipeline_mode<synchronous>, transform_indices = @transform_7, window_bounds = array<i64: 8, 128>}, {pipeline_mode = #tpu.pipeline_mode<synchronous>, transform_indices = @transform_8, window_bounds = array<i64: 8, 128>}]} {
    %c0_i32 = arith.constant 0 : i32
    %0 = arith.cmpi eq, %arg0, %c0_i32 : i32
    %1 = arith.extui %0 : i1 to i32
    %c0_i32_0 = arith.constant 0 : i32
    %2 = arith.cmpi ne, %1, %c0_i32_0 : i32
    scf.if %2 {
      %c0_79 = arith.constant 0 : index
      %c0_80 = arith.constant 0 : index
      %297 = vector.load %arg2[%c0_79, %c0_80] : memref<8x128xf32, #tpu.memory_space<vmem>>, vector<8x128xf32>
      %c0_81 = arith.constant 0 : index
      %c0_82 = arith.constant 0 : index
      %298 = vector.load %arg11[%c0_81, %c0_82] : memref<8x128xf32, #tpu.memory_space<vmem>>, vector<8x128xf32>
      tpu.vector_store %arg11[%c0_81, %c0_82], %297 {strides = array<i32>} : memref<8x128xf32, #tpu.memory_space<vmem>>, vector<8x128xf32>,
      %c0_83 = arith.constant 0 : index
      %c0_84 = arith.constant 0 : index
      %299 = vector.load %arg3[%c0_83, %c0_84] : memref<8x128xf32, #tpu.memory_space<vmem>>, vector<8x128xf32>
      %c0_85 = arith.constant 0 : index
      %c0_86 = arith.constant 0 : index
      %300 = vector.load %arg12[%c0_85, %c0_86] : memref<8x128xf32, #tpu.memory_space<vmem>>, vector<8x128xf32>
      tpu.vector_store %arg12[%c0_85, %c0_86], %299 {strides = array<i32>} : memref<8x128xf32, #tpu.memory_space<vmem>>, vector<8x128xf32>,
    } else {
    }
    %c0 = arith.constant 0 : index
    %c0_1 = arith.constant 0 : index
    %3 = vector.load %arg1[%c0, %c0_1] : memref<64x128xbf16, #tpu.memory_space<vmem>>, vector<64x128xbf16>
    %c0_2 = arith.constant 0 : index
    %c0_3 = arith.constant 0 : index
    %4 = vector.load %arg4[%c0_2, %c0_3] : memref<128x512xbf16, #tpu.memory_space<vmem>>, vector<128x512xbf16>
    %cst = arith.constant dense<0.000000e+00> : vector<64x512xf32>
    %5 = tpu.matmul %3, %4, %cst {dimension_numbers = #tpu.dot_dimension_numbers<[1], [0], [0], [1], [0, 0, 1, 1], [], []>} : vector<64x128xbf16>, vector<128x512xbf16>, vector<64x512xf32> -> vector<64x512xf32>
    %c0_4 = arith.constant 0 : index
    %c0_5 = arith.constant 0 : index
    %6 = vector.load %arg6[%c0_4, %c0_5] : memref<1x512xf32, #tpu.memory_space<vmem>>, vector<1x512xf32>
    %7 = vector.broadcast %6 : vector<1x512xf32> to vector<64x512xf32>
    %8 = arith.addf %5, %7 : vector<64x512xf32>
    %c0_6 = arith.constant 0 : index
    %c0_7 = arith.constant 0 : index
    %9 = vector.load %arg10[%c0_6, %c0_7] : memref<64x512xf32, #tpu.memory_space<vmem>>, vector<64x512xf32>
    tpu.vector_store %arg10[%c0_6, %c0_7], %8 {strides = array<i32>} : memref<64x512xf32, #tpu.memory_space<vmem>>, vector<64x512xf32>,
    %c0_8 = arith.constant 0 : index
    %c0_9 = arith.constant 0 : index
    %10 = vector.load %arg5[%c0_8, %c0_9] : memref<128x512xbf16, #tpu.memory_space<vmem>>, vector<128x512xbf16>
    %c0_10 = arith.constant 0 : index
    %c0_11 = arith.constant 0 : index
    %11 = vector.load %arg11[%c0_10, %c0_11] : memref<8x128xf32, #tpu.memory_space<vmem>>, vector<8x128xf32>
    %c0_12 = arith.constant 0 : index
    %c0_13 = arith.constant 0 : index
    %12 = vector.load %arg12[%c0_12, %c0_13] : memref<8x128xf32, #tpu.memory_space<vmem>>, vector<8x128xf32>
    %c0_i32_14 = arith.constant 0 : i32
    %c8_i32 = arith.constant 8 : i32
    %13 = arith.muli %c0_i32_14, %c8_i32 : i32
    %14 = tpu.assume_multiple %13, 8 : i32
    %15 = arith.index_cast %14 : i32 to index
    %c0_15 = arith.constant 0 : index
    %16 = vector.load %arg10[%15, %c0_15] : memref<64x512xf32, #tpu.memory_space<vmem>>, vector<8x512xf32>
    %17 = arith.truncf %11 : vector<8x128xf32> to vector<8x128xbf16>
    %cst_16 = arith.constant dense<0.000000e+00> : vector<8x512xf32>
    %18 = tpu.matmul %17, %10, %cst_16 {dimension_numbers = #tpu.dot_dimension_numbers<[1], [0], [0], [1], [0, 0, 1, 1], [], []>} : vector<8x128xbf16>, vector<128x512xbf16>, vector<8x512xf32> -> vector<8x512xf32>
    %19 = arith.addf %16, %18 : vector<8x512xf32>
    %20 = vector.extract_strided_slice %19 {offsets = [0, 0], sizes = [8, 128], strides = [1, 1]} : vector<8x512xf32> to vector<8x128xf32>
    %21 = arith.negf %20 : vector<8x128xf32>
    %22 = math.exp %21 : vector<8x128xf32>
    %cst_17 = arith.constant 1.000000e+00 : f32
    %23 = vector.broadcast %cst_17 : f32 to vector<8x128xf32>
    %24 = arith.addf %23, %22 : vector<8x128xf32>
    %25 = arith.divf %23, %24 : vector<8x128xf32>
    %26 = vector.extract_strided_slice %19 {offsets = [0, 128], sizes = [8, 128], strides = [1, 1]} : vector<8x512xf32> to vector<8x128xf32>
    %27 = arith.negf %26 : vector<8x128xf32>
    %28 = math.exp %27 : vector<8x128xf32>
    %cst_18 = arith.constant 1.000000e+00 : f32
    %29 = vector.broadcast %cst_18 : f32 to vector<8x128xf32>
    %30 = arith.addf %29, %28 : vector<8x128xf32>
    %31 = arith.divf %29, %30 : vector<8x128xf32>
    %32 = vector.extract_strided_slice %19 {offsets = [0, 256], sizes = [8, 128], strides = [1, 1]} : vector<8x512xf32> to vector<8x128xf32>
    %33 = math.tanh %32 : vector<8x128xf32>
    %34 = vector.extract_strided_slice %19 {offsets = [0, 384], sizes = [8, 128], strides = [1, 1]} : vector<8x512xf32> to vector<8x128xf32>
    %35 = arith.negf %34 : vector<8x128xf32>
    %36 = math.exp %35 : vector<8x128xf32>
    %cst_19 = arith.constant 1.000000e+00 : f32
    %37 = vector.broadcast %cst_19 : f32 to vector<8x128xf32>
    %38 = arith.addf %37, %36 : vector<8x128xf32>
    %39 = arith.divf %37, %38 : vector<8x128xf32>
    %40 = arith.mulf %31, %12 : vector<8x128xf32>
    %41 = arith.mulf %25, %33 : vector<8x128xf32>
    %42 = arith.addf %40, %41 : vector<8x128xf32>
    %43 = math.tanh %42 : vector<8x128xf32>
    %44 = arith.mulf %39, %43 : vector<8x128xf32>
    %45 = arith.truncf %44 : vector<8x128xf32> to vector<8x128xbf16>
    %46 = arith.index_cast %14 : i32 to index
    %c0_20 = arith.constant 0 : index
    %47 = vector.load %arg7[%46, %c0_20] : memref<64x128xbf16, #tpu.memory_space<vmem>>, vector<8x128xbf16>
    tpu.vector_store %arg7[%46, %c0_20], %45 {strides = array<i32>} : memref<64x128xbf16, #tpu.memory_space<vmem>>, vector<8x128xbf16>,
    %c1_i32 = arith.constant 1 : i32
    %c8_i32_21 = arith.constant 8 : i32
    %48 = arith.muli %c1_i32, %c8_i32_21 : i32
    %49 = tpu.assume_multiple %48, 8 : i32
    %50 = arith.index_cast %49 : i32 to index
    %c0_22 = arith.constant 0 : index
    %51 = vector.load %arg10[%50, %c0_22] : memref<64x512xf32, #tpu.memory_space<vmem>>, vector<8x512xf32>
    %52 = arith.truncf %44 : vector<8x128xf32> to vector<8x128xbf16>
    %cst_23 = arith.constant dense<0.000000e+00> : vector<8x512xf32>
    %53 = tpu.matmul %52, %10, %cst_23 {dimension_numbers = #tpu.dot_dimension_numbers<[1], [0], [0], [1], [0, 0, 1, 1], [], []>} : vector<8x128xbf16>, vector<128x512xbf16>, vector<8x512xf32> -> vector<8x512xf32>
    %54 = arith.addf %51, %53 : vector<8x512xf32>
    %55 = vector.extract_strided_slice %54 {offsets = [0, 0], sizes = [8, 128], strides = [1, 1]} : vector<8x512xf32> to vector<8x128xf32>
    %56 = arith.negf %55 : vector<8x128xf32>
    %57 = math.exp %56 : vector<8x128xf32>
    %cst_24 = arith.constant 1.000000e+00 : f32
    %58 = vector.broadcast %cst_24 : f32 to vector<8x128xf32>
    %59 = arith.addf %58, %57 : vector<8x128xf32>
    %60 = arith.divf %58, %59 : vector<8x128xf32>
    %61 = vector.extract_strided_slice %54 {offsets = [0, 128], sizes = [8, 128], strides = [1, 1]} : vector<8x512xf32> to vector<8x128xf32>
    %62 = arith.negf %61 : vector<8x128xf32>
    %63 = math.exp %62 : vector<8x128xf32>
    %cst_25 = arith.constant 1.000000e+00 : f32
    %64 = vector.broadcast %cst_25 : f32 to vector<8x128xf32>
    %65 = arith.addf %64, %63 : vector<8x128xf32>
    %66 = arith.divf %64, %65 : vector<8x128xf32>
    %67 = vector.extract_strided_slice %54 {offsets = [0, 256], sizes = [8, 128], strides = [1, 1]} : vector<8x512xf32> to vector<8x128xf32>
    %68 = math.tanh %67 : vector<8x128xf32>
    %69 = vector.extract_strided_slice %54 {offsets = [0, 384], sizes = [8, 128], strides = [1, 1]} : vector<8x512xf32> to vector<8x128xf32>
    %70 = arith.negf %69 : vector<8x128xf32>
    %71 = math.exp %70 : vector<8x128xf32>
    %cst_26 = arith.constant 1.000000e+00 : f32
    %72 = vector.broadcast %cst_26 : f32 to vector<8x128xf32>
    %73 = arith.addf %72, %71 : vector<8x128xf32>
    %74 = arith.divf %72, %73 : vector<8x128xf32>
    %75 = arith.mulf %66, %42 : vector<8x128xf32>
    %76 = arith.mulf %60, %68 : vector<8x128xf32>
    %77 = arith.addf %75, %76 : vector<8x128xf32>
    %78 = math.tanh %77 : vector<8x128xf32>
    %79 = arith.mulf %74, %78 : vector<8x128xf32>
    %80 = arith.truncf %79 : vector<8x128xf32> to vector<8x128xbf16>
    %81 = arith.index_cast %49 : i32 to index
    %c0_27 = arith.constant 0 : index
    %82 = vector.load %arg7[%81, %c0_27] : memref<64x128xbf16, #tpu.memory_space<vmem>>, vector<8x128xbf16>
    tpu.vector_store %arg7[%81, %c0_27], %80 {strides = array<i32>} : memref<64x128xbf16, #tpu.memory_space<vmem>>, vector<8x128xbf16>,
    %c2_i32 = arith.constant 2 : i32
    %c8_i32_28 = arith.constant 8 : i32
    %83 = arith.muli %c2_i32, %c8_i32_28 : i32
    %84 = tpu.assume_multiple %83, 8 : i32
    %85 = arith.index_cast %84 : i32 to index
    %c0_29 = arith.constant 0 : index
    %86 = vector.load %arg10[%85, %c0_29] : memref<64x512xf32, #tpu.memory_space<vmem>>, vector<8x512xf32>
    %87 = arith.truncf %79 : vector<8x128xf32> to vector<8x128xbf16>
    %cst_30 = arith.constant dense<0.000000e+00> : vector<8x512xf32>
    %88 = tpu.matmul %87, %10, %cst_30 {dimension_numbers = #tpu.dot_dimension_numbers<[1], [0], [0], [1], [0, 0, 1, 1], [], []>} : vector<8x128xbf16>, vector<128x512xbf16>, vector<8x512xf32> -> vector<8x512xf32>
    %89 = arith.addf %86, %88 : vector<8x512xf32>
    %90 = vector.extract_strided_slice %89 {offsets = [0, 0], sizes = [8, 128], strides = [1, 1]} : vector<8x512xf32> to vector<8x128xf32>
    %91 = arith.negf %90 : vector<8x128xf32>
    %92 = math.exp %91 : vector<8x128xf32>
    %cst_31 = arith.constant 1.000000e+00 : f32
    %93 = vector.broadcast %cst_31 : f32 to vector<8x128xf32>
    %94 = arith.addf %93, %92 : vector<8x128xf32>
    %95 = arith.divf %93, %94 : vector<8x128xf32>
    %96 = vector.extract_strided_slice %89 {offsets = [0, 128], sizes = [8, 128], strides = [1, 1]} : vector<8x512xf32> to vector<8x128xf32>
    %97 = arith.negf %96 : vector<8x128xf32>
    %98 = math.exp %97 : vector<8x128xf32>
    %cst_32 = arith.constant 1.000000e+00 : f32
    %99 = vector.broadcast %cst_32 : f32 to vector<8x128xf32>
    %100 = arith.addf %99, %98 : vector<8x128xf32>
    %101 = arith.divf %99, %100 : vector<8x128xf32>
    %102 = vector.extract_strided_slice %89 {offsets = [0, 256], sizes = [8, 128], strides = [1, 1]} : vector<8x512xf32> to vector<8x128xf32>
    %103 = math.tanh %102 : vector<8x128xf32>
    %104 = vector.extract_strided_slice %89 {offsets = [0, 384], sizes = [8, 128], strides = [1, 1]} : vector<8x512xf32> to vector<8x128xf32>
    %105 = arith.negf %104 : vector<8x128xf32>
    %106 = math.exp %105 : vector<8x128xf32>
    %cst_33 = arith.constant 1.000000e+00 : f32
    %107 = vector.broadcast %cst_33 : f32 to vector<8x128xf32>
    %108 = arith.addf %107, %106 : vector<8x128xf32>
    %109 = arith.divf %107, %108 : vector<8x128xf32>
    %110 = arith.mulf %101, %77 : vector<8x128xf32>
    %111 = arith.mulf %95, %103 : vector<8x128xf32>
    %112 = arith.addf %110, %111 : vector<8x128xf32>
    %113 = math.tanh %112 : vector<8x128xf32>
    %114 = arith.mulf %109, %113 : vector<8x128xf32>
    %115 = arith.truncf %114 : vector<8x128xf32> to vector<8x128xbf16>
    %116 = arith.index_cast %84 : i32 to index
    %c0_34 = arith.constant 0 : index
    %117 = vector.load %arg7[%116, %c0_34] : memref<64x128xbf16, #tpu.memory_space<vmem>>, vector<8x128xbf16>
    tpu.vector_store %arg7[%116, %c0_34], %115 {strides = array<i32>} : memref<64x128xbf16, #tpu.memory_space<vmem>>, vector<8x128xbf16>,
    %c3_i32 = arith.constant 3 : i32
    %c8_i32_35 = arith.constant 8 : i32
    %118 = arith.muli %c3_i32, %c8_i32_35 : i32
    %119 = tpu.assume_multiple %118, 8 : i32
    %120 = arith.index_cast %119 : i32 to index
    %c0_36 = arith.constant 0 : index
    %121 = vector.load %arg10[%120, %c0_36] : memref<64x512xf32, #tpu.memory_space<vmem>>, vector<8x512xf32>
    %122 = arith.truncf %114 : vector<8x128xf32> to vector<8x128xbf16>
    %cst_37 = arith.constant dense<0.000000e+00> : vector<8x512xf32>
    %123 = tpu.matmul %122, %10, %cst_37 {dimension_numbers = #tpu.dot_dimension_numbers<[1], [0], [0], [1], [0, 0, 1, 1], [], []>} : vector<8x128xbf16>, vector<128x512xbf16>, vector<8x512xf32> -> vector<8x512xf32>
    %124 = arith.addf %121, %123 : vector<8x512xf32>
    %125 = vector.extract_strided_slice %124 {offsets = [0, 0], sizes = [8, 128], strides = [1, 1]} : vector<8x512xf32> to vector<8x128xf32>
    %126 = arith.negf %125 : vector<8x128xf32>
    %127 = math.exp %126 : vector<8x128xf32>
    %cst_38 = arith.constant 1.000000e+00 : f32
    %128 = vector.broadcast %cst_38 : f32 to vector<8x128xf32>
    %129 = arith.addf %128, %127 : vector<8x128xf32>
    %130 = arith.divf %128, %129 : vector<8x128xf32>
    %131 = vector.extract_strided_slice %124 {offsets = [0, 128], sizes = [8, 128], strides = [1, 1]} : vector<8x512xf32> to vector<8x128xf32>
    %132 = arith.negf %131 : vector<8x128xf32>
    %133 = math.exp %132 : vector<8x128xf32>
    %cst_39 = arith.constant 1.000000e+00 : f32
    %134 = vector.broadcast %cst_39 : f32 to vector<8x128xf32>
    %135 = arith.addf %134, %133 : vector<8x128xf32>
    %136 = arith.divf %134, %135 : vector<8x128xf32>
    %137 = vector.extract_strided_slice %124 {offsets = [0, 256], sizes = [8, 128], strides = [1, 1]} : vector<8x512xf32> to vector<8x128xf32>
    %138 = math.tanh %137 : vector<8x128xf32>
    %139 = vector.extract_strided_slice %124 {offsets = [0, 384], sizes = [8, 128], strides = [1, 1]} : vector<8x512xf32> to vector<8x128xf32>
    %140 = arith.negf %139 : vector<8x128xf32>
    %141 = math.exp %140 : vector<8x128xf32>
    %cst_40 = arith.constant 1.000000e+00 : f32
    %142 = vector.broadcast %cst_40 : f32 to vector<8x128xf32>
    %143 = arith.addf %142, %141 : vector<8x128xf32>
    %144 = arith.divf %142, %143 : vector<8x128xf32>
    %145 = arith.mulf %136, %112 : vector<8x128xf32>
    %146 = arith.mulf %130, %138 : vector<8x128xf32>
    %147 = arith.addf %145, %146 : vector<8x128xf32>
    %148 = math.tanh %147 : vector<8x128xf32>
    %149 = arith.mulf %144, %148 : vector<8x128xf32>
    %150 = arith.truncf %149 : vector<8x128xf32> to vector<8x128xbf16>
    %151 = arith.index_cast %119 : i32 to index
    %c0_41 = arith.constant 0 : index
    %152 = vector.load %arg7[%151, %c0_41] : memref<64x128xbf16, #tpu.memory_space<vmem>>, vector<8x128xbf16>
    tpu.vector_store %arg7[%151, %c0_41], %150 {strides = array<i32>} : memref<64x128xbf16, #tpu.memory_space<vmem>>, vector<8x128xbf16>,
    %c4_i32 = arith.constant 4 : i32
    %c8_i32_42 = arith.constant 8 : i32
    %153 = arith.muli %c4_i32, %c8_i32_42 : i32
    %154 = tpu.assume_multiple %153, 8 : i32
    %155 = arith.index_cast %154 : i32 to index
    %c0_43 = arith.constant 0 : index
    %156 = vector.load %arg10[%155, %c0_43] : memref<64x512xf32, #tpu.memory_space<vmem>>, vector<8x512xf32>
    %157 = arith.truncf %149 : vector<8x128xf32> to vector<8x128xbf16>
    %cst_44 = arith.constant dense<0.000000e+00> : vector<8x512xf32>
    %158 = tpu.matmul %157, %10, %cst_44 {dimension_numbers = #tpu.dot_dimension_numbers<[1], [0], [0], [1], [0, 0, 1, 1], [], []>} : vector<8x128xbf16>, vector<128x512xbf16>, vector<8x512xf32> -> vector<8x512xf32>
    %159 = arith.addf %156, %158 : vector<8x512xf32>
    %160 = vector.extract_strided_slice %159 {offsets = [0, 0], sizes = [8, 128], strides = [1, 1]} : vector<8x512xf32> to vector<8x128xf32>
    %161 = arith.negf %160 : vector<8x128xf32>
    %162 = math.exp %161 : vector<8x128xf32>
    %cst_45 = arith.constant 1.000000e+00 : f32
    %163 = vector.broadcast %cst_45 : f32 to vector<8x128xf32>
    %164 = arith.addf %163, %162 : vector<8x128xf32>
    %165 = arith.divf %163, %164 : vector<8x128xf32>
    %166 = vector.extract_strided_slice %159 {offsets = [0, 128], sizes = [8, 128], strides = [1, 1]} : vector<8x512xf32> to vector<8x128xf32>
    %167 = arith.negf %166 : vector<8x128xf32>
    %168 = math.exp %167 : vector<8x128xf32>
    %cst_46 = arith.constant 1.000000e+00 : f32
    %169 = vector.broadcast %cst_46 : f32 to vector<8x128xf32>
    %170 = arith.addf %169, %168 : vector<8x128xf32>
    %171 = arith.divf %169, %170 : vector<8x128xf32>
    %172 = vector.extract_strided_slice %159 {offsets = [0, 256], sizes = [8, 128], strides = [1, 1]} : vector<8x512xf32> to vector<8x128xf32>
    %173 = math.tanh %172 : vector<8x128xf32>
    %174 = vector.extract_strided_slice %159 {offsets = [0, 384], sizes = [8, 128], strides = [1, 1]} : vector<8x512xf32> to vector<8x128xf32>
    %175 = arith.negf %174 : vector<8x128xf32>
    %176 = math.exp %175 : vector<8x128xf32>
    %cst_47 = arith.constant 1.000000e+00 : f32
    %177 = vector.broadcast %cst_47 : f32 to vector<8x128xf32>
    %178 = arith.addf %177, %176 : vector<8x128xf32>
    %179 = arith.divf %177, %178 : vector<8x128xf32>
    %180 = arith.mulf %171, %147 : vector<8x128xf32>
    %181 = arith.mulf %165, %173 : vector<8x128xf32>
    %182 = arith.addf %180, %181 : vector<8x128xf32>
    %183 = math.tanh %182 : vector<8x128xf32>
    %184 = arith.mulf %179, %183 : vector<8x128xf32>
    %185 = arith.truncf %184 : vector<8x128xf32> to vector<8x128xbf16>
    %186 = arith.index_cast %154 : i32 to index
    %c0_48 = arith.constant 0 : index
    %187 = vector.load %arg7[%186, %c0_48] : memref<64x128xbf16, #tpu.memory_space<vmem>>, vector<8x128xbf16>
    tpu.vector_store %arg7[%186, %c0_48], %185 {strides = array<i32>} : memref<64x128xbf16, #tpu.memory_space<vmem>>, vector<8x128xbf16>,
    %c5_i32 = arith.constant 5 : i32
    %c8_i32_49 = arith.constant 8 : i32
    %188 = arith.muli %c5_i32, %c8_i32_49 : i32
    %189 = tpu.assume_multiple %188, 8 : i32
    %190 = arith.index_cast %189 : i32 to index
    %c0_50 = arith.constant 0 : index
    %191 = vector.load %arg10[%190, %c0_50] : memref<64x512xf32, #tpu.memory_space<vmem>>, vector<8x512xf32>
    %192 = arith.truncf %184 : vector<8x128xf32> to vector<8x128xbf16>
    %cst_51 = arith.constant dense<0.000000e+00> : vector<8x512xf32>
    %193 = tpu.matmul %192, %10, %cst_51 {dimension_numbers = #tpu.dot_dimension_numbers<[1], [0], [0], [1], [0, 0, 1, 1], [], []>} : vector<8x128xbf16>, vector<128x512xbf16>, vector<8x512xf32> -> vector<8x512xf32>
    %194 = arith.addf %191, %193 : vector<8x512xf32>
    %195 = vector.extract_strided_slice %194 {offsets = [0, 0], sizes = [8, 128], strides = [1, 1]} : vector<8x512xf32> to vector<8x128xf32>
    %196 = arith.negf %195 : vector<8x128xf32>
    %197 = math.exp %196 : vector<8x128xf32>
    %cst_52 = arith.constant 1.000000e+00 : f32
    %198 = vector.broadcast %cst_52 : f32 to vector<8x128xf32>
    %199 = arith.addf %198, %197 : vector<8x128xf32>
    %200 = arith.divf %198, %199 : vector<8x128xf32>
    %201 = vector.extract_strided_slice %194 {offsets = [0, 128], sizes = [8, 128], strides = [1, 1]} : vector<8x512xf32> to vector<8x128xf32>
    %202 = arith.negf %201 : vector<8x128xf32>
    %203 = math.exp %202 : vector<8x128xf32>
    %cst_53 = arith.constant 1.000000e+00 : f32
    %204 = vector.broadcast %cst_53 : f32 to vector<8x128xf32>
    %205 = arith.addf %204, %203 : vector<8x128xf32>
    %206 = arith.divf %204, %205 : vector<8x128xf32>
    %207 = vector.extract_strided_slice %194 {offsets = [0, 256], sizes = [8, 128], strides = [1, 1]} : vector<8x512xf32> to vector<8x128xf32>
    %208 = math.tanh %207 : vector<8x128xf32>
    %209 = vector.extract_strided_slice %194 {offsets = [0, 384], sizes = [8, 128], strides = [1, 1]} : vector<8x512xf32> to vector<8x128xf32>
    %210 = arith.negf %209 : vector<8x128xf32>
    %211 = math.exp %210 : vector<8x128xf32>
    %cst_54 = arith.constant 1.000000e+00 : f32
    %212 = vector.broadcast %cst_54 : f32 to vector<8x128xf32>
    %213 = arith.addf %212, %211 : vector<8x128xf32>
    %214 = arith.divf %212, %213 : vector<8x128xf32>
    %215 = arith.mulf %206, %182 : vector<8x128xf32>
    %216 = arith.mulf %200, %208 : vector<8x128xf32>
    %217 = arith.addf %215, %216 : vector<8x128xf32>
    %218 = math.tanh %217 : vector<8x128xf32>
    %219 = arith.mulf %214, %218 : vector<8x128xf32>
    %220 = arith.truncf %219 : vector<8x128xf32> to vector<8x128xbf16>
    %221 = arith.index_cast %189 : i32 to index
    %c0_55 = arith.constant 0 : index
    %222 = vector.load %arg7[%221, %c0_55] : memref<64x128xbf16, #tpu.memory_space<vmem>>, vector<8x128xbf16>
    tpu.vector_store %arg7[%221, %c0_55], %220 {strides = array<i32>} : memref<64x128xbf16, #tpu.memory_space<vmem>>, vector<8x128xbf16>,
    %c6_i32 = arith.constant 6 : i32
    %c8_i32_56 = arith.constant 8 : i32
    %223 = arith.muli %c6_i32, %c8_i32_56 : i32
    %224 = tpu.assume_multiple %223, 8 : i32
    %225 = arith.index_cast %224 : i32 to index
    %c0_57 = arith.constant 0 : index
    %226 = vector.load %arg10[%225, %c0_57] : memref<64x512xf32, #tpu.memory_space<vmem>>, vector<8x512xf32>
    %227 = arith.truncf %219 : vector<8x128xf32> to vector<8x128xbf16>
    %cst_58 = arith.constant dense<0.000000e+00> : vector<8x512xf32>
    %228 = tpu.matmul %227, %10, %cst_58 {dimension_numbers = #tpu.dot_dimension_numbers<[1], [0], [0], [1], [0, 0, 1, 1], [], []>} : vector<8x128xbf16>, vector<128x512xbf16>, vector<8x512xf32> -> vector<8x512xf32>
    %229 = arith.addf %226, %228 : vector<8x512xf32>
    %230 = vector.extract_strided_slice %229 {offsets = [0, 0], sizes = [8, 128], strides = [1, 1]} : vector<8x512xf32> to vector<8x128xf32>
    %231 = arith.negf %230 : vector<8x128xf32>
    %232 = math.exp %231 : vector<8x128xf32>
    %cst_59 = arith.constant 1.000000e+00 : f32
    %233 = vector.broadcast %cst_59 : f32 to vector<8x128xf32>
    %234 = arith.addf %233, %232 : vector<8x128xf32>
    %235 = arith.divf %233, %234 : vector<8x128xf32>
    %236 = vector.extract_strided_slice %229 {offsets = [0, 128], sizes = [8, 128], strides = [1, 1]} : vector<8x512xf32> to vector<8x128xf32>
    %237 = arith.negf %236 : vector<8x128xf32>
    %238 = math.exp %237 : vector<8x128xf32>
    %cst_60 = arith.constant 1.000000e+00 : f32
    %239 = vector.broadcast %cst_60 : f32 to vector<8x128xf32>
    %240 = arith.addf %239, %238 : vector<8x128xf32>
    %241 = arith.divf %239, %240 : vector<8x128xf32>
    %242 = vector.extract_strided_slice %229 {offsets = [0, 256], sizes = [8, 128], strides = [1, 1]} : vector<8x512xf32> to vector<8x128xf32>
    %243 = math.tanh %242 : vector<8x128xf32>
    %244 = vector.extract_strided_slice %229 {offsets = [0, 384], sizes = [8, 128], strides = [1, 1]} : vector<8x512xf32> to vector<8x128xf32>
    %245 = arith.negf %244 : vector<8x128xf32>
    %246 = math.exp %245 : vector<8x128xf32>
    %cst_61 = arith.constant 1.000000e+00 : f32
    %247 = vector.broadcast %cst_61 : f32 to vector<8x128xf32>
    %248 = arith.addf %247, %246 : vector<8x128xf32>
    %249 = arith.divf %247, %248 : vector<8x128xf32>
    %250 = arith.mulf %241, %217 : vector<8x128xf32>
    %251 = arith.mulf %235, %243 : vector<8x128xf32>
    %252 = arith.addf %250, %251 : vector<8x128xf32>
    %253 = math.tanh %252 : vector<8x128xf32>
    %254 = arith.mulf %249, %253 : vector<8x128xf32>
    %255 = arith.truncf %254 : vector<8x128xf32> to vector<8x128xbf16>
    %256 = arith.index_cast %224 : i32 to index
    %c0_62 = arith.constant 0 : index
    %257 = vector.load %arg7[%256, %c0_62] : memref<64x128xbf16, #tpu.memory_space<vmem>>, vector<8x128xbf16>
    tpu.vector_store %arg7[%256, %c0_62], %255 {strides = array<i32>} : memref<64x128xbf16, #tpu.memory_space<vmem>>, vector<8x128xbf16>,
    %c7_i32 = arith.constant 7 : i32
    %c8_i32_63 = arith.constant 8 : i32
    %258 = arith.muli %c7_i32, %c8_i32_63 : i32
    %259 = tpu.assume_multiple %258, 8 : i32
    %260 = arith.index_cast %259 : i32 to index
    %c0_64 = arith.constant 0 : index
    %261 = vector.load %arg10[%260, %c0_64] : memref<64x512xf32, #tpu.memory_space<vmem>>, vector<8x512xf32>
    %262 = arith.truncf %254 : vector<8x128xf32> to vector<8x128xbf16>
    %cst_65 = arith.constant dense<0.000000e+00> : vector<8x512xf32>
    %263 = tpu.matmul %262, %10, %cst_65 {dimension_numbers = #tpu.dot_dimension_numbers<[1], [0], [0], [1], [0, 0, 1, 1], [], []>} : vector<8x128xbf16>, vector<128x512xbf16>, vector<8x512xf32> -> vector<8x512xf32>
    %264 = arith.addf %261, %263 : vector<8x512xf32>
    %265 = vector.extract_strided_slice %264 {offsets = [0, 0], sizes = [8, 128], strides = [1, 1]} : vector<8x512xf32> to vector<8x128xf32>
    %266 = arith.negf %265 : vector<8x128xf32>
    %267 = math.exp %266 : vector<8x128xf32>
    %cst_66 = arith.constant 1.000000e+00 : f32
    %268 = vector.broadcast %cst_66 : f32 to vector<8x128xf32>
    %269 = arith.addf %268, %267 : vector<8x128xf32>
    %270 = arith.divf %268, %269 : vector<8x128xf32>
    %271 = vector.extract_strided_slice %264 {offsets = [0, 128], sizes = [8, 128], strides = [1, 1]} : vector<8x512xf32> to vector<8x128xf32>
    %272 = arith.negf %271 : vector<8x128xf32>
    %273 = math.exp %272 : vector<8x128xf32>
    %cst_67 = arith.constant 1.000000e+00 : f32
    %274 = vector.broadcast %cst_67 : f32 to vector<8x128xf32>
    %275 = arith.addf %274, %273 : vector<8x128xf32>
    %276 = arith.divf %274, %275 : vector<8x128xf32>
    %277 = vector.extract_strided_slice %264 {offsets = [0, 256], sizes = [8, 128], strides = [1, 1]} : vector<8x512xf32> to vector<8x128xf32>
    %278 = math.tanh %277 : vector<8x128xf32>
    %279 = vector.extract_strided_slice %264 {offsets = [0, 384], sizes = [8, 128], strides = [1, 1]} : vector<8x512xf32> to vector<8x128xf32>
    %280 = arith.negf %279 : vector<8x128xf32>
    %281 = math.exp %280 : vector<8x128xf32>
    %cst_68 = arith.constant 1.000000e+00 : f32
    %282 = vector.broadcast %cst_68 : f32 to vector<8x128xf32>
    %283 = arith.addf %282, %281 : vector<8x128xf32>
    %284 = arith.divf %282, %283 : vector<8x128xf32>
    %285 = arith.mulf %276, %252 : vector<8x128xf32>
    %286 = arith.mulf %270, %278 : vector<8x128xf32>
    %287 = arith.addf %285, %286 : vector<8x128xf32>
    %288 = math.tanh %287 : vector<8x128xf32>
    %289 = arith.mulf %284, %288 : vector<8x128xf32>
    %290 = arith.truncf %289 : vector<8x128xf32> to vector<8x128xbf16>
    %291 = arith.index_cast %259 : i32 to index
    %c0_69 = arith.constant 0 : index
    %292 = vector.load %arg7[%291, %c0_69] : memref<64x128xbf16, #tpu.memory_space<vmem>>, vector<8x128xbf16>
    tpu.vector_store %arg7[%291, %c0_69], %290 {strides = array<i32>} : memref<64x128xbf16, #tpu.memory_space<vmem>>, vector<8x128xbf16>,
    %c8_i32_70 = arith.constant 8 : i32
    %c0_71 = arith.constant 0 : index
    %c0_72 = arith.constant 0 : index
    %293 = vector.load %arg11[%c0_71, %c0_72] : memref<8x128xf32, #tpu.memory_space<vmem>>, vector<8x128xf32>
    tpu.vector_store %arg11[%c0_71, %c0_72], %289 {strides = array<i32>} : memref<8x128xf32, #tpu.memory_space<vmem>>, vector<8x128xf32>,
    %c0_73 = arith.constant 0 : index
    %c0_74 = arith.constant 0 : index
    %294 = vector.load %arg12[%c0_73, %c0_74] : memref<8x128xf32, #tpu.memory_space<vmem>>, vector<8x128xf32>
    tpu.vector_store %arg12[%c0_73, %c0_74], %287 {strides = array<i32>} : memref<8x128xf32, #tpu.memory_space<vmem>>, vector<8x128xf32>,
    %c0_75 = arith.constant 0 : index
    %c0_76 = arith.constant 0 : index
    %295 = vector.load %arg8[%c0_75, %c0_76] : memref<8x128xf32, #tpu.memory_space<vmem>>, vector<8x128xf32>
    tpu.vector_store %arg8[%c0_75, %c0_76], %289 {strides = array<i32>} : memref<8x128xf32, #tpu.memory_space<vmem>>, vector<8x128xf32>,
    %c0_77 = arith.constant 0 : index
    %c0_78 = arith.constant 0 : index
    %296 = vector.load %arg9[%c0_77, %c0_78] : memref<8x128xf32, #tpu.memory_space<vmem>>, vector<8x128xf32>
    tpu.vector_store %arg9[%c0_77, %c0_78], %287 {strides = array<i32>} : memref<8x128xf32, #tpu.memory_space<vmem>>, vector<8x128xf32>,
    return
  }
  func.func @transform_0(%arg0: i32) -> (i32, i32) {
    %c0_i32 = arith.constant 0 : i32
    %c0_i32_0 = arith.constant 0 : i32
    return %arg0, %c0_i32 : i32, i32
  }
  func.func @transform_1(%arg0: i32) -> (i32, i32) {
    %c0_i32 = arith.constant 0 : i32
    %c0_i32_0 = arith.constant 0 : i32
    %c0_i32_1 = arith.constant 0 : i32
    return %c0_i32, %c0_i32_0 : i32, i32
  }
  func.func @transform_2(%arg0: i32) -> (i32, i32) {
    %c0_i32 = arith.constant 0 : i32
    %c0_i32_0 = arith.constant 0 : i32
    %c0_i32_1 = arith.constant 0 : i32
    return %c0_i32, %c0_i32_0 : i32, i32
  }
  func.func @transform_3(%arg0: i32) -> (i32, i32) {
    %c0_i32 = arith.constant 0 : i32
    %c0_i32_0 = arith.constant 0 : i32
    %c0_i32_1 = arith.constant 0 : i32
    return %c0_i32, %c0_i32_0 : i32, i32
  }
  func.func @transform_4(%arg0: i32) -> (i32, i32) {
    %c0_i32 = arith.constant 0 : i32
    %c0_i32_0 = arith.constant 0 : i32
    %c0_i32_1 = arith.constant 0 : i32
    return %c0_i32, %c0_i32_0 : i32, i32
  }
  func.func @transform_5(%arg0: i32) -> (i32, i32) {
    %c0_i32 = arith.constant 0 : i32
    %c0_i32_0 = arith.constant 0 : i32
    %c0_i32_1 = arith.constant 0 : i32
    return %c0_i32, %c0_i32_0 : i32, i32
  }
  func.func @transform_6(%arg0: i32) -> (i32, i32) {
    %c0_i32 = arith.constant 0 : i32
    %c0_i32_0 = arith.constant 0 : i32
    return %arg0, %c0_i32 : i32, i32
  }
  func.func @transform_7(%arg0: i32) -> (i32, i32) {
    %c0_i32 = arith.constant 0 : i32
    %c0_i32_0 = arith.constant 0 : i32
    %c0_i32_1 = arith.constant 0 : i32
    return %c0_i32, %c0_i32_0 : i32, i32
  }
  func.func @transform_8(%arg0: i32) -> (i32, i32) {
    %c0_i32 = arith.constant 0 : i32
    %c0_i32_0 = arith.constant 0 : i32
    %c0_i32_1 = arith.constant 0 : i32
    return %c0_i32, %c0_i32_0 : i32, i32
  }
}

</mosaic_0001>

<bundles_post_ra>
// kernel: tpu_custom_call.1
= control target key start
LH: loop header
LB: loop body
LE: loop exit
PB: predicated region body
PF: predicated region fallthrough
CT: control target
= control target key end

     0   :  { %14 = vsyncpa [#allocation6], 0  ;;  %s2995_s0 = inlined_call_operand.hbm [shape: bf16[64,128], index: 0, kind: input, shape index: {}]   ;;  %s2996_s1 = inlined_call_operand.hbm [shape: f32[8,128], index: 1, kind: input, shape index: {}]   ;;  %s2997_s2 = inlined_call_operand.hbm [shape: f32[8,128], index: 2, kind: input, shape index: {}]   ;;  %s2998_s3 = inlined_call_operand.hbm [shape: bf16[128,512], index: 3, kind: input, shape index: {}]   ;;  %s2999_s4 = inlined_call_operand.hbm [shape: bf16[128,512], index: 4, kind: input, shape index: {}]   ;;  %s3000_s5 = inlined_call_operand.vmem [shape: f32[1,512], index: 5, kind: input, shape index: {}]   ;;  %s3001_s6 = inlined_call_operand.hbm [shape: bf16[64,128], index: 6, kind: output, shape index: {0}]   ;;  %s3002_s7 = inlined_call_operand.hbm [shape: f32[8,128], index: 7, kind: output, shape index: {1}]   ;;  %s3003_s8 = inlined_call_operand.hbm [shape: f32[8,128], index: 8, kind: output, shape index: {2}]  }
   0x1   :  { %15 = vsyncpa [#allocation9], 0 }
   0x2   :  { %16 = vsyncpa [#allocation12], 0 }
   0x3   :  { %17 = vsyncpa [#allocation7], 0 }
   0x4   :  { %18 = vsyncpa [#allocation16], 0  ;;  %s2287_s27 = smov [#allocation8]   ;;  %s2288_s29 = smov [#allocation11]  }
   0x5   :  { %s37_s28 = sshll.u32 %s2287_s27, 4  ;;  %s56_s30 = sshll.u32 %s2288_s29, 4  ;;  %s38_s28 = int_to_ptr.vmem [resolvable:$true] %s37_s28  ;;  %s2345_s30 = int_to_ptr.vmem [resolvable:$true] %s56_s30 }
   0x6   :  { %s2101_s11 = scalar_lea.hbm %s2996_s1, 128 }
   0x7   :  { %p2102_p0 = scmp.ne.s32.totalorder %s2996_s1, %s2101_s11  ;;  %p2105_p1 = scmp.lt.u32.totalorder %s2101_s11, %s2996_s1 }
   0x9   :  { %p2107_p2 = pnand %p2105_p1, %p2102_p0 }
   0xb   :  { %2110 = shalt.err (!%p2107_p2)
}
   0xc   :  { %s2111_s16 = scalar_lea.vmem %s38_s28, 128  ;;  %p2116_p4 = scmp.lt.s32.totalorder %s38_s28, %s38_s28 }
   0xd   :  { %p2112_p3 = scmp.ne.s32.totalorder %s38_s28, %s2111_s16  ;;  %p2117_p5 = scmp.lt.s32.totalorder %s2111_s16, %s2111_s16 }
   0xf   :  { %p2118_p6 = por %p2117_p5, %p2116_p4 }
  0x11   :  { %p2119_p7 = pnand %p2118_p6, %p2112_p3 }
  0x13   :  { %2122 = shalt.err (!%p2119_p7)
}
  0x14   :  { %40 = dma.hbm_to_vmem [thread:$0]  %s2996_s1, 128, %s38_s28, [#allocation9]  }
  0x15   :  { %s2123_s21 = scalar_lea.hbm %s2998_s3, 4096 }
  0x16   :  { %p2124_p8 = scmp.ne.s32.totalorder %s2998_s3, %s2123_s21  ;;  %p2127_p9 = scmp.lt.u32.totalorder %s2123_s21, %s2998_s3 }
  0x18   :  { %p2129_p10 = pnand %p2127_p9, %p2124_p8 }
  0x1a   :  { %2132 = shalt.err (!%p2129_p10)
}
  0x1b   :  { %s2133_s26 = scalar_lea.vmem %s2345_s30, 4096  ;;  %p2138_p12 = scmp.lt.s32.totalorder %s2345_s30, %s2345_s30 }
  0x1c   :  { %p2134_p11 = scmp.ne.s32.totalorder %s2345_s30, %s2133_s26  ;;  %p2139_p13 = scmp.lt.s32.totalorder %s2133_s26, %s2133_s26 }
  0x1e   :  { %p2140_p0 = por %p2139_p13, %p2138_p12 }
  0x20   :  { %p2141_p1 = pnand %p2140_p0, %p2134_p11 }
  0x22   :  { %2144 = shalt.err (!%p2141_p1)
}
  0x23   :  { %s2289_s1 = smov 256   ;;  %s2290_s27 = smov 16  }
  0x24   :  { %62 = dma.hbm_to_vmem [thread:$0]  %s2998_s3, 4096, %s2345_s30, [#allocation12], %s2289_s1, %s2289_s1, %s2290_s27  }
  0x25   :  { %s2291_s9 = smov [#allocation5]   ;;  %s2145_s13 = scalar_lea.hbm %s2995_s0, 512 }
  0x26   :  { %s24_s10 = sshll.u32 %s2291_s9, 4  ;;  %p2146_p2 = scmp.ne.s32.totalorder %s2995_s0, %s2145_s13  ;;  %s25_s10 = int_to_ptr.vmem [resolvable:$true] %s24_s10 }
  0x27   :  { %p2149_p3 = scmp.lt.u32.totalorder %s2145_s13, %s2995_s0 }
  0x29   :  { %p2151_p4 = pnand %p2149_p3, %p2146_p2 }
  0x2b   :  { %2154 = shalt.err (!%p2151_p4)
}
  0x2c   :  { %s2155_s18 = scalar_lea.vmem %s25_s10, 512  ;;  %p2160_p6 = scmp.lt.s32.totalorder %s25_s10, %s25_s10 }
  0x2d   :  { %p2156_p5 = scmp.ne.s32.totalorder %s25_s10, %s2155_s18  ;;  %p2161_p7 = scmp.lt.s32.totalorder %s2155_s18, %s2155_s18 }
  0x2f   :  { %p2162_p8 = por %p2161_p7, %p2160_p6 }
  0x31   :  { %p2163_p9 = pnand %p2162_p8, %p2156_p5 }
  0x33   :  { %2166 = shalt.err (!%p2163_p9)
}
  0x34   :  { %s2292_s3 = smov 64   ;;  %s2293_s30 = smov 4  }
  0x35   :  { %30 = dma.hbm_to_vmem [thread:$0]  %s2995_s0, 512, %s25_s10, [#allocation6], %s2292_s3, %s2292_s3, %s2293_s30  }
  0x36   :  { %s2294_s21 = smov [#allocation10]   ;;  %s2295_s23 = smov [#allocation13]  }
  0x37   :  { %s47_s22 = sshll.u32 %s2294_s21, 4  ;;  %s68_s24 = sshll.u32 %s2295_s23, 4  ;;  %s48_s22 = int_to_ptr.vmem [resolvable:$true] %s47_s22  ;;  %s69_s24 = int_to_ptr.vmem [resolvable:$true] %s68_s24 }
  0x38   :  { %s2167_s28 = scalar_lea.hbm %s2997_s2, 128 }
  0x39   :  { %p2168_p10 = scmp.ne.s32.totalorder %s2997_s2, %s2167_s28  ;;  %p2171_p11 = scmp.lt.u32.totalorder %s2167_s28, %s2997_s2 }
  0x3b   :  { %p2173_p12 = pnand %p2171_p11, %p2168_p10 }
  0x3d   :  { %2176 = shalt.err (!%p2173_p12)
}
  0x3e   :  { %s2177_s0 = scalar_lea.vmem %s48_s22, 128  ;;  %p2182_p0 = scmp.lt.s32.totalorder %s48_s22, %s48_s22 }
  0x3f   :  { %p2178_p13 = scmp.ne.s32.totalorder %s48_s22, %s2177_s0  ;;  %p2183_p1 = scmp.lt.s32.totalorder %s2177_s0, %s2177_s0 }
  0x41   :  { %p2184_p2 = por %p2183_p1, %p2182_p0 }
  0x43   :  { %p2185_p3 = pnand %p2184_p2, %p2178_p13 }
  0x45   :  { %2188 = shalt.err (!%p2185_p3)
}
  0x46   :  { %50 = dma.hbm_to_vmem [thread:$0]  %s2997_s2, 128, %s48_s22, [#allocation9]  }
  0x47   :  { %s2189_s16 = scalar_lea.hbm %s2999_s4, 4096 }
  0x48   :  { %p2190_p4 = scmp.ne.s32.totalorder %s2999_s4, %s2189_s16  ;;  %p2193_p5 = scmp.lt.u32.totalorder %s2189_s16, %s2999_s4 }
  0x4a   :  { %p2195_p6 = pnand %p2193_p5, %p2190_p4 }
  0x4c   :  { %2198 = shalt.err (!%p2195_p6)
}
  0x4d   :  { %s2199_s21 = scalar_lea.vmem %s69_s24, 4096  ;;  %p2204_p8 = scmp.lt.s32.totalorder %s69_s24, %s69_s24 }
  0x4e   :  { %p2200_p7 = scmp.ne.s32.totalorder %s69_s24, %s2199_s21  ;;  %p2205_p9 = scmp.lt.s32.totalorder %s2199_s21, %s2199_s21 }
  0x50   :  { %p2206_p10 = por %p2205_p9, %p2204_p8 }
  0x52   :  { %p2207_p11 = pnand %p2206_p10, %p2200_p7 }
  0x54   :  { %2210 = shalt.err (!%p2207_p11)
}
  0x55   :  { %74 = dma.hbm_to_vmem [thread:$0]  %s2999_s4, 4096, %s69_s24, [#allocation12], %s2289_s1, %s2289_s1, %s2290_s27  }
  0x56   :  { %2277 = dma.done.wait [#allocation6], 512  }
  0x57   :  { %2278 = vsyncadd [#allocation6], 4294966784 }
  0x58   :  { %2279 = dma.done.wait [#allocation9], 256  }
  0x59   :  { %2280 = vsyncadd [#allocation9], 4294967040 }
  0x5a   :  { %2281 = dma.done.wait [#allocation12], 8192  }
  0x5b   :  { %2282 = vsyncadd [#allocation12], 4294959104  ;;  %v3004_v0 = vmov 0   ;;  %v1841_v1 = vld [vmem:[#allocation11 + $0x4] ss:$16 sps:$4 sm:$0xff]   ;;  %v1902_v44 = vld [vmem:[#allocation5 + $0x8] sm:$0xff]  }
  0x5c   :  { %379 = vmatprep.mubr.bf16.mxu0 %v3004_v0  ;;  %452 = vmatprep.mubr.bf16.mxu1 %v3004_v0  ;;  %v1843_v2 = vld [vmem:[#allocation11 + $0xc] ss:$16 sps:$4 sm:$0xff]   ;;  %v1845_v3 = vld [vmem:[#allocation11] ss:$16 sps:$4 sm:$0xff]   ;;  %v1846_v4 = vld [vmem:[#allocation11 + $0x8] ss:$16 sps:$4 sm:$0xff]  }
  0x5d   :  { %347 = vmatprep.subr.bf16.mxu0 %v1841_v1  ;;  %420 = vmatprep.subr.bf16.mxu1 %v1843_v2  ;;  %v1847_v5 = vld [vmem:[#allocation11 + $0x24] ss:$16 sps:$4 sm:$0xff]   ;;  %v1849_v6 = vld [vmem:[#allocation11 + $0x2c] ss:$16 sps:$4 sm:$0xff]   ;;  %v1851_v7 = vld [vmem:[#allocation11 + $0x20] ss:$16 sps:$4 sm:$0xff]  }
  0x5e   :  { %348 = vmatpush1.bf16.msra.mxu0 %v1845_v3  ;;  %421 = vmatpush1.bf16.msra.mxu1 %v1846_v4  ;;  %v1852_v8 = vld [vmem:[#allocation11 + $0x28] ss:$16 sps:$4 sm:$0xff]   ;;  %v1853_v9 = vld [vmem:[#allocation11 + $0x44] ss:$16 sps:$4 sm:$0xff]   ;;  %v1855_v10 = vld [vmem:[#allocation11 + $0x4c] ss:$16 sps:$4 sm:$0xff]  }
  0x5f   :  { %349 = vmatprep.subr.bf16.mxu0 %v1847_v5  ;;  %422 = vmatprep.subr.bf16.mxu1 %v1849_v6  ;;  %v1857_v11 = vld [vmem:[#allocation11 + $0x40] ss:$16 sps:$4 sm:$0xff]   ;;  %v1858_v12 = vld [vmem:[#allocation11 + $0x48] ss:$16 sps:$4 sm:$0xff]   ;;  %v1859_v13 = vld [vmem:[#allocation11 + $0x64] ss:$16 sps:$4 sm:$0xff]  }
  0x60   :  { %v1861_v14 = vld [vmem:[#allocation11 + $0x6c] ss:$16 sps:$4 sm:$0xff]   ;;  %v1863_v15 = vld [vmem:[#allocation11 + $0x60] ss:$16 sps:$4 sm:$0xff]   ;;  %v1864_v16 = vld [vmem:[#allocation11 + $0x68] ss:$16 sps:$4 sm:$0xff]  }
  0x61   :  { %v1865_v17 = vld [vmem:[#allocation11 + $0x84] ss:$16 sps:$4 sm:$0xff]   ;;  %v1867_v18 = vld [vmem:[#allocation11 + $0x8c] ss:$16 sps:$4 sm:$0xff]   ;;  %v1869_v19 = vld [vmem:[#allocation11 + $0x80] ss:$16 sps:$4 sm:$0xff]  }
  0x62   :  { %350 = vmatpush1.bf16.msra.mxu0 %v1851_v7  ;;  %423 = vmatpush1.bf16.msra.mxu1 %v1852_v8  ;;  %v1870_v20 = vld [vmem:[#allocation11 + $0x88] ss:$16 sps:$4 sm:$0xff]   ;;  %v1871_v21 = vld [vmem:[#allocation11 + $0xa4] ss:$16 sps:$4 sm:$0xff]   ;;  %v1873_v22 = vld [vmem:[#allocation11 + $0xac] ss:$16 sps:$4 sm:$0xff]   ;;  %v143_v8 = vlaneseq }
  0x63   :  { %351 = vmatprep.subr.bf16.mxu0 %v1853_v9  ;;  %424 = vmatprep.subr.bf16.mxu1 %v1855_v10  ;;  %v1875_v23 = vld [vmem:[#allocation11 + $0xa0] ss:$16 sps:$4 sm:$0xff]   ;;  %v1876_v24 = vld [vmem:[#allocation11 + $0xa8] ss:$16 sps:$4 sm:$0xff]   ;;  %v1877_v25 = vld [vmem:[#allocation11 + $0xc4] ss:$16 sps:$4 sm:$0xff]  }
  0x64   :  { %v1879_v26 = vld [vmem:[#allocation11 + $0xcc] ss:$16 sps:$4 sm:$0xff]   ;;  %v1881_v27 = vld [vmem:[#allocation11 + $0xc0] ss:$16 sps:$4 sm:$0xff]   ;;  %v1882_v28 = vld [vmem:[#allocation11 + $0xc8] ss:$16 sps:$4 sm:$0xff]  }
  0x65   :  { %v1883_v29 = vld [vmem:[#allocation11 + $0xe4] ss:$16 sps:$4 sm:$0xff]   ;;  %v1885_v30 = vld [vmem:[#allocation11 + $0xec] ss:$16 sps:$4 sm:$0xff]   ;;  %v1887_v31 = vld [vmem:[#allocation11 + $0xe0] ss:$16 sps:$4 sm:$0xff]  }
  0x66   :  { %352 = vmatpush1.bf16.msra.mxu0 %v1857_v11  ;;  %425 = vmatpush1.bf16.msra.mxu1 %v1858_v12  ;;  %v1888_v32 = vld [vmem:[#allocation11 + $0xe8] ss:$16 sps:$4 sm:$0xff]   ;;  %v2423_v33 = vld [vmem:[#allocation13 + $0x4] ss:$16 sps:$4 sm:$0xff]   ;;  %v2425_v34 = vld [vmem:[#allocation13 + $0xc] ss:$16 sps:$4 sm:$0xff]  }
  0x67   :  { %353 = vmatprep.subr.bf16.mxu0 %v1859_v13  ;;  %426 = vmatprep.subr.bf16.mxu1 %v1861_v14  ;;  %v1889_v35 = vld [vmem:[#allocation5] sm:$0xff]   ;;  %v2429_v37 = vld [vmem:[#allocation13 + $0x8] ss:$16 sps:$4 sm:$0xff]   ;;  %v2435_v39 = vld [vmem:[#allocation13 + $0x2c] ss:$16 sps:$4 sm:$0xff]   ;;  %v144_v9 = vshrl.u32 %v143_v8, 7 }
  0x68   :  { %v2427_v36 = vld [vmem:[#allocation13] ss:$16 sps:$4 sm:$0xff]   ;;  %v2433_v38 = vld [vmem:[#allocation13 + $0x24] ss:$16 sps:$4 sm:$0xff]   ;;  %v2441_v41 = vld [vmem:[#allocation13 + $0x28] ss:$16 sps:$4 sm:$0xff]  }
  0x69   :  { %v2437_v40 = vld [vmem:[#allocation13 + $0x20] ss:$16 sps:$4 sm:$0xff]   ;;  %v2445_v42 = vld [vmem:[#allocation13 + $0x44] ss:$16 sps:$4 sm:$0xff]   ;;  %v2447_v43 = vld [vmem:[#allocation13 + $0x4c] ss:$16 sps:$4 sm:$0xff]  }
  0x6a   :  { %354 = vmatpush1.bf16.msra.mxu0 %v1863_v15  ;;  %427 = vmatpush1.bf16.msra.mxu1 %v1864_v16  ;;  %v2451_v45 = vld [vmem:[#allocation13 + $0x40] ss:$16 sps:$4 sm:$0xff]   ;;  %v2453_v46 = vld [vmem:[#allocation13 + $0x48] ss:$16 sps:$4 sm:$0xff]   ;;  %v2457_v47 = vld [vmem:[#allocation13 + $0x64] ss:$16 sps:$4 sm:$0xff]  }
  0x6b   :  { %355 = vmatprep.subr.bf16.mxu0 %v1865_v17  ;;  %428 = vmatprep.subr.bf16.mxu1 %v1867_v18  ;;  %v2461_v48 = vld [vmem:[#allocation13 + $0x6c] ss:$16 sps:$4 sm:$0xff]   ;;  %v2463_v49 = vld [vmem:[#allocation13 + $0x60] ss:$16 sps:$4 sm:$0xff]   ;;  %v2465_v50 = vld [vmem:[#allocation13 + $0x68] ss:$16 sps:$4 sm:$0xff]  }
  0x6c   :  { %v2469_v51 = vld [vmem:[#allocation13 + $0x84] ss:$16 sps:$4 sm:$0xff]   ;;  %v2473_v52 = vld [vmem:[#allocation13 + $0x8c] ss:$16 sps:$4 sm:$0xff]   ;;  %v2479_v54 = vld [vmem:[#allocation13 + $0x80] ss:$16 sps:$4 sm:$0xff]  }
  0x6d   :  { %v1915_v53 = vld [vmem:[#allocation5 + $0x10] sm:$0xff]   ;;  %v2481_v55 = vld [vmem:[#allocation13 + $0x88] ss:$16 sps:$4 sm:$0xff]   ;;  %v2487_v57 = vld [vmem:[#allocation13 + $0xac] ss:$16 sps:$4 sm:$0xff]   ;;  %v153_v10 = vsub.s32 2, %v144_v9 }
  0x6e   :  { %356 = vmatpush1.bf16.msra.mxu0 %v1869_v19  ;;  %429 = vmatpush1.bf16.msra.mxu1 %v1870_v20  ;;  %v2485_v56 = vld [vmem:[#allocation13 + $0xa4] ss:$16 sps:$4 sm:$0xff]   ;;  %v2491_v58 = vld [vmem:[#allocation13 + $0xa0] ss:$16 sps:$4 sm:$0xff]   ;;  %v2493_v59 = vld [vmem:[#allocation13 + $0xa8] ss:$16 sps:$4 sm:$0xff]  }
  0x6f   :  { %357 = vmatprep.subr.bf16.mxu0 %v1871_v21  ;;  %430 = vmatprep.subr.bf16.mxu1 %v1873_v22  ;;  %v2497_v60 = vld [vmem:[#allocation13 + $0xc4] ss:$16 sps:$4 sm:$0xff]   ;;  %v2499_v61 = vld [vmem:[#allocation13 + $0xcc] ss:$16 sps:$4 sm:$0xff]   ;;  %v2505_v63 = vld [vmem:[#allocation13 + $0xc0] ss:$16 sps:$4 sm:$0xff]  }
  0x70   :  { %v1928_v62 = vld [vmem:[#allocation5 + $0x18] sm:$0xff]   ;;  %v2511_v2 = vld [vmem:[#allocation13 + $0xe4] ss:$16 sps:$4 sm:$0xff]   ;;  %v2517_v4 = vld [vmem:[#allocation13 + $0xe0] ss:$16 sps:$4 sm:$0xff]   ;;  %v157_v11 = vsub.s32 3, %v144_v9 }
  0x71   :  { %v2507_v1 = vld [vmem:[#allocation13 + $0xc8] ss:$16 sps:$4 sm:$0xff]   ;;  %v2513_v3 = vld [vmem:[#allocation13 + $0xec] ss:$16 sps:$4 sm:$0xff]   ;;  %v97_v6 = vld [vmem:[#allocation8] sm:$0xff]  ;;  %v145_v12 = vsub.s32 0, %v144_v9 }
  0x72   :  { %358 = vmatpush1.bf16.msra.mxu0 %v1875_v23  ;;  %431 = vmatpush1.bf16.msra.mxu1 %v1876_v24  ;;  %v2519_v5 = vld [vmem:[#allocation13 + $0xe8] ss:$16 sps:$4 sm:$0xff]   ;;  %v566_v7 = vpack.c.bf16 %v97_v6, %v97_v6  ;;  %v141_v13 = vld [vmem:[%s3000_s5] sm:$0xf]  ;;  %v149_v14 = vsub.s32 1, %v144_v9  ;;  %s2297_s5 = smov [#allocation15]  }
  0x73   :  { %359 = vmatprep.subr.bf16.mxu0 %v1877_v25  ;;  %432 = vmatprep.subr.bf16.mxu1 %v1879_v26  ;;  %v2566_v15 = vrot.slane %v141_v13, %v153_v10  ;;  %v2572_v18 = vrot.slane %v141_v13, %v157_v11  ;;  %v146_v19 = vrot.slane %v141_v13, %v145_v12  ;;  %s1701_s27 = sshll.u32 %s2297_s5, 4  ;;  %s2298_s23 = smov [#allocation17]   ;;  %s1702_s27 = int_to_ptr.vmem [resolvable:$true] %s1701_s27 }
  0x74   :  { %v150_v22 = vrot.slane %v141_v13, %v149_v14  ;;  %s1711_s24 = sshll.u32 %s2298_s23, 4  ;;  %s2299_s25 = smov [#allocation14]   ;;  %s2942_s24 = int_to_ptr.vmem [resolvable:$true] %s1711_s24 }
  0x75   :  { %s1688_s26 = sshll.u32 %s2299_s25, 4  ;;  %s2211_s28 = scalar_lea.vmem %s1702_s27, 128  ;;  %s2944_s26 = int_to_ptr.vmem [resolvable:$true] %s1688_s26 }
  0x76   :  { %360 = vmatpush1.bf16.msra.mxu0 %v1881_v27  ;;  %433 = vmatpush1.bf16.msra.mxu1 %v1882_v28  ;;  %p2212_p12 = scmp.ne.s32.totalorder %s1702_s27, %s2211_s28  ;;  %p2216_p13 = scmp.lt.s32.totalorder %s1702_s27, %s1702_s27 }
  0x77   :  { %361 = vmatprep.subr.bf16.mxu0 %v1883_v29  ;;  %434 = vmatprep.subr.bf16.mxu1 %v1885_v30  ;;  %p2217_p0 = scmp.lt.s32.totalorder %s2211_s28, %s2211_s28 }
  0x79   :  { %p2218_p1 = por %p2217_p0, %p2216_p13 }
  0x7a   :  { %362 = vmatpush1.bf16.msra.mxu0 %v1887_v31  ;;  %435 = vmatpush1.bf16.msra.mxu1 %v1888_v32 }
  0x7b   :  { %727 = vmatprep.subr.bf16.mxu0 %v2423_v33  ;;  %768 = vmatprep.subr.bf16.mxu1 %v2425_v34  ;;  %p2219_p2 = pnand %p2218_p1, %p2212_p12 }
  0x7d   :  { %380 = vmatmul.mubr.bf16.vlgmr.msra.gmra.mrb[0].mxu0 %v1889_v35  ;;  %453 = vmatmul.mubr.bf16.vlgmr.msra.gmra.mrb[0].mxu1 %v1889_v35 }
  0x7e   :  { %728 = vmatpush1.bf16.msra.mxu0 %v2427_v36  ;;  %769 = vmatpush1.bf16.msra.mxu1 %v2429_v37 }
  0x7f   :  { %729 = vmatprep.subr.bf16.mxu0 %v2433_v38  ;;  %770 = vmatprep.subr.bf16.mxu1 %v2435_v39 }
  0x80   :  { %389 = vmatprep.mubr.bf16.mxu0 %v3004_v0  ;;  %462 = vmatprep.mubr.bf16.mxu1 %v3004_v0 }
  0x82   :  { %730 = vmatpush1.bf16.msra.mxu0 %v2437_v40  ;;  %771 = vmatpush1.bf16.msra.mxu1 %v2441_v41 }
  0x83   :  { %731 = vmatprep.subr.bf16.mxu0 %v2445_v42  ;;  %772 = vmatprep.subr.bf16.mxu1 %v2447_v43 }
  0x85   :  { %390 = vmatmul.mubr.bf16.gmra.mrb[4].mxu0 %v1902_v44  ;;  %463 = vmatmul.mubr.bf16.gmra.mrb[4].mxu1 %v1902_v44 }
  0x86   :  { %732 = vmatpush1.bf16.msra.mxu0 %v2451_v45  ;;  %773 = vmatpush1.bf16.msra.mxu1 %v2453_v46 }
  0x87   :  { %733 = vmatprep.subr.bf16.mxu0 %v2457_v47  ;;  %774 = vmatprep.subr.bf16.mxu1 %v2461_v48 }
  0x88   :  { %399 = vmatprep.mubr.bf16.mxu0 %v3004_v0  ;;  %472 = vmatprep.mubr.bf16.mxu1 %v3004_v0 }
  0x8a   :  { %734 = vmatpush1.bf16.msra.mxu0 %v2463_v49  ;;  %775 = vmatpush1.bf16.msra.mxu1 %v2465_v50 }
  0x8b   :  { %735 = vmatprep.subr.bf16.mxu0 %v2469_v51  ;;  %776 = vmatprep.subr.bf16.mxu1 %v2473_v52 }
  0x8d   :  { %400 = vmatmul.mubr.bf16.gmra.mrb[8].mxu0 %v1915_v53  ;;  %473 = vmatmul.mubr.bf16.gmra.mrb[8].mxu1 %v1915_v53 }
  0x8e   :  { %736 = vmatpush1.bf16.msra.mxu0 %v2479_v54  ;;  %777 = vmatpush1.bf16.msra.mxu1 %v2481_v55 }
  0x8f   :  { %737 = vmatprep.subr.bf16.mxu0 %v2485_v56  ;;  %778 = vmatprep.subr.bf16.mxu1 %v2487_v57 }
  0x90   :  { %409 = vmatprep.mubr.bf16.mxu0 %v3004_v0  ;;  %482 = vmatprep.mubr.bf16.mxu1 %v3004_v0 }
  0x92   :  { %738 = vmatpush1.bf16.msra.mxu0 %v2491_v58  ;;  %779 = vmatpush1.bf16.msra.mxu1 %v2493_v59 }
  0x93   :  { %739 = vmatprep.subr.bf16.mxu0 %v2497_v60  ;;  %780 = vmatprep.subr.bf16.mxu1 %v2499_v61 }
  0x95   :  { %410 = vmatmul.mubr.bf16.gmra.mrb[12].mxu0 %v1928_v62  ;;  %483 = vmatmul.mubr.bf16.gmra.mrb[12].mxu1 %v1928_v62 }
  0x96   :  { %740 = vmatpush1.bf16.msra.mxu0 %v2505_v63  ;;  %781 = vmatpush1.bf16.msra.mxu1 %v2507_v1 }
  0x97   :  { %741 = vmatprep.subr.bf16.mxu0 %v2511_v2  ;;  %782 = vmatprep.subr.bf16.mxu1 %v2513_v3 }
  0x98   :  { %759 = vmatprep.mubr.bf16.mxu0 %v3004_v0  ;;  %800 = vmatprep.mubr.bf16.mxu1 %v3004_v0 }
  0x9a   :  { %742 = vmatpush1.bf16.msra.mxu0 %v2517_v4  ;;  %783 = vmatpush1.bf16.msra.mxu1 %v2519_v5 }
  0x9b   :  { %846 = vmatprep.subr.bf16.mxu0 %v2423_v33  ;;  %887 = vmatprep.subr.bf16.mxu1 %v2425_v34 }
  0x9d   :  { %760 = vmatmul.mubr.bf16.vlgmr.msra.gmra.mrb[16].mxu0 %v566_v7  ;;  %801 = vmatmul.mubr.bf16.vlgmr.msra.gmra.mrb[16].mxu1 %v566_v7 }
  0x9e   :  { %847 = vmatpush1.bf16.msra.mxu0 %v2427_v36  ;;  %888 = vmatpush1.bf16.msra.mxu1 %v2429_v37 }
  0x9f   :  { %848 = vmatprep.subr.bf16.mxu0 %v2433_v38  ;;  %889 = vmatprep.subr.bf16.mxu1 %v2435_v39 }
  0xa0   :  { %878 = vmatprep.mubr.bf16.mxu0 %v3004_v0  ;;  %919 = vmatprep.mubr.bf16.mxu1 %v3004_v0 }
  0xa2   :  { %849 = vmatpush1.bf16.msra.mxu0 %v2437_v40  ;;  %890 = vmatpush1.bf16.msra.mxu1 %v2441_v41 }
  0xa3   :  { %850 = vmatprep.subr.bf16.mxu0 %v2445_v42  ;;  %891 = vmatprep.subr.bf16.mxu1 %v2447_v43 }
  0xa6   :  { %851 = vmatpush1.bf16.msra.mxu0 %v2451_v45  ;;  %892 = vmatpush1.bf16.msra.mxu1 %v2453_v46 }
  0xa7   :  { %852 = vmatprep.subr.bf16.mxu0 %v2457_v47  ;;  %893 = vmatprep.subr.bf16.mxu1 %v2461_v48 }
  0xaa   :  { %853 = vmatpush1.bf16.msra.mxu0 %v2463_v49  ;;  %894 = vmatpush1.bf16.msra.mxu1 %v2465_v50 }
  0xab   :  { %854 = vmatprep.subr.bf16.mxu0 %v2469_v51  ;;  %895 = vmatprep.subr.bf16.mxu1 %v2473_v52 }
  0xae   :  { %855 = vmatpush1.bf16.msra.mxu0 %v2479_v54  ;;  %896 = vmatpush1.bf16.msra.mxu1 %v2481_v55 }
  0xaf   :  { %856 = vmatprep.subr.bf16.mxu0 %v2485_v56  ;;  %897 = vmatprep.subr.bf16.mxu1 %v2487_v57 }
  0xb2   :  { %857 = vmatpush1.bf16.msra.mxu0 %v2491_v58  ;;  %898 = vmatpush1.bf16.msra.mxu1 %v2493_v59 }
  0xb3   :  { %858 = vmatprep.subr.bf16.mxu0 %v2497_v60  ;;  %899 = vmatprep.subr.bf16.mxu1 %v2499_v61 }
  0xb6   :  { %859 = vmatpush1.bf16.msra.mxu0 %v2505_v63  ;;  %900 = vmatpush1.bf16.msra.mxu1 %v2507_v1 }
  0xb7   :  { %860 = vmatprep.subr.bf16.mxu0 %v2511_v2  ;;  %901 = vmatprep.subr.bf16.mxu1 %v2513_v3 }
  0xba   :  { %861 = vmatpush1.bf16.msra.mxu0 %v2517_v4  ;;  %902 = vmatpush1.bf16.msra.mxu1 %v2519_v5 }
  0xbb   :  { %966 = vmatprep.subr.bf16.mxu0 %v2423_v33  ;;  %1007 = vmatprep.subr.bf16.mxu1 %v2425_v34 }
 0x150   :  { %v2568_v16 = vpop.f32.mrb[0].mxu0  ;;  %v2570_v17 = vpop.f32.mrb[0].mxu1 }
 0x151   :  { %v383_v20 = vpop.f32.mrb[1].mxu0  ;;  %v456_v21 = vpop.f32.mrb[1].mxu1 }
 0x152   :  { %v385_v23 = vpop.f32.mrb[2].mxu0  ;;  %v458_v24 = vpop.f32.mrb[2].mxu1 }
 0x153   :  { %v2574_v25 = vadd.f32 %v385_v23, %v146_v19  ;;  %v387_v26 = vpop.f32.mrb[3].mxu0  ;;  %v2577_v27 = vadd.f32 %v458_v24, %v2566_v15  ;;  %v460_v28 = vpop.f32.mrb[3].mxu1 }
 0x154   :  { %v2579_v29 = vadd.f32 %v387_v26, %v150_v22  ;;  %v2582_v30 = vadd.f32 %v460_v28, %v2572_v18 }
 0x158   :  { %v391_v31 = vpop.f32.mrb[4].mxu0  ;;  %v464_v32 = vpop.f32.mrb[4].mxu1 }
 0x159   :  { %v2584_v35 = vadd.f32 %v391_v31, %v146_v19  ;;  %v393_v44 = vpop.f32.mrb[5].mxu0  ;;  %v2587_v53 = vadd.f32 %v464_v32, %v2566_v15  ;;  %v466_v62 = vpop.f32.mrb[5].mxu1 }
 0x15a   :  { %v2589_v6 = vadd.f32 %v393_v44, %v150_v22  ;;  %v395_v7 = vpop.f32.mrb[6].mxu0  ;;  %v2592_v8 = vadd.f32 %v466_v62, %v2572_v18  ;;  %v468_v9 = vpop.f32.mrb[6].mxu1 }
 0x15b   :  { %v2594_v10 = vadd.f32 %v395_v7, %v146_v19  ;;  %v397_v11 = vpop.f32.mrb[7].mxu0  ;;  %v2597_v12 = vadd.f32 %v468_v9, %v2566_v15  ;;  %v470_v13 = vpop.f32.mrb[7].mxu1 }
 0x15c   :  { %3006 = vst [vmem:[#allocation23_spill] sm:$0xff] %v2592_v8  ;;  %v2599_v14 = vadd.f32 %v397_v11, %v150_v22  ;;  %v2602_v23 = vadd.f32 %v470_v13, %v2572_v18 }
 0x15d   :  { %3007 = vst [vmem:[#allocation24_spill] sm:$0xff] %v2594_v10  ;;  %3008 = vst [vmem:[#allocation25_spill] sm:$0xff] %v2597_v12 }
 0x15e   :  { %3009 = vst [vmem:[#allocation26_spill] sm:$0xff] %v2599_v14  ;;  %3010 = vst [vmem:[#allocation27_spill] sm:$0xff] %v2602_v23 }
 0x160   :  { %v401_v24 = vpop.f32.mrb[8].mxu0  ;;  %v474_v26 = vpop.f32.mrb[8].mxu1 }
 0x161   :  { %v2604_v28 = vadd.f32 %v401_v24, %v146_v19  ;;  %v403_v31 = vpop.f32.mrb[9].mxu0  ;;  %v2607_v32 = vadd.f32 %v474_v26, %v2566_v15  ;;  %v476_v44 = vpop.f32.mrb[9].mxu1 }
 0x162   :  { %v2609_v62 = vadd.f32 %v403_v31, %v150_v22  ;;  %v405_v7 = vpop.f32.mrb[10].mxu0  ;;  %v2612_v9 = vadd.f32 %v476_v44, %v2572_v18  ;;  %v478_v11 = vpop.f32.mrb[10].mxu1 }
 0x163   :  { %3011 = vst [vmem:[#allocation28_spill] sm:$0xff] %v2604_v28  ;;  %3012 = vst [vmem:[#allocation29_spill] sm:$0xff] %v2607_v32  ;;  %v2614_v0 = vadd.f32 %v405_v7, %v146_v19  ;;  %v407_v13 = vpop.f32.mrb[11].mxu0  ;;  %v2617_v23 = vadd.f32 %v478_v11, %v2566_v15  ;;  %v480_v24 = vpop.f32.mrb[11].mxu1 }
 0x164   :  { %3013 = vst [vmem:[#allocation30_spill] sm:$0xff] %v2609_v62  ;;  %3014 = vst [vmem:[#allocation31_spill] sm:$0xff] %v2612_v9  ;;  %v2619_v28 = vadd.f32 %v407_v13, %v150_v22  ;;  %v2622_v26 = vadd.f32 %v480_v24, %v2572_v18 }
 0x165   :  { %3015 = vst [vmem:[#allocation32_spill] sm:$0xff] %v2614_v0  ;;  %3016 = vst [vmem:[#allocation33_spill] sm:$0xff] %v2617_v23 }
 0x166   :  { %3017 = vst [vmem:[#allocation34_spill] sm:$0xff] %v2619_v28  ;;  %3018 = vst [vmem:[#allocation35_spill] sm:$0xff] %v2622_v26 }
 0x168   :  { %v411_v32 = vpop.f32.mrb[12].mxu0  ;;  %v484_v31 = vpop.f32.mrb[12].mxu1 }
 0x169   :  { %v2624_v62 = vadd.f32 %v411_v32, %v146_v19  ;;  %v413_v14 = vpop.f32.mrb[13].mxu0  ;;  %v2627_v44 = vadd.f32 %v484_v31, %v2566_v15  ;;  %v486_v7 = vpop.f32.mrb[13].mxu1 }
 0x16a   :  { %v2629_v0 = vadd.f32 %v413_v14, %v150_v22  ;;  %v415_v9 = vpop.f32.mrb[14].mxu0  ;;  %v2632_v11 = vadd.f32 %v486_v7, %v2572_v18  ;;  %v488_v13 = vpop.f32.mrb[14].mxu1  ;;  %v382_v14 = vadd.f32 %v2568_v16, %v146_v19  ;;  %v384_v7 = vadd.f32 %v383_v20, %v150_v22 }
 0x16b   :  { %3019 = vst [vmem:[#allocation36_spill] sm:$0xff] %v2624_v62  ;;  %3020 = vst [vmem:[#allocation37_spill] sm:$0xff] %v2627_v44  ;;  %v2634_v28 = vadd.f32 %v415_v9, %v146_v19  ;;  %v417_v24 = vpop.f32.mrb[15].mxu0  ;;  %v2637_v26 = vadd.f32 %v488_v13, %v2566_v15  ;;  %v490_v32 = vpop.f32.mrb[15].mxu1 }
 0x16c   :  { %3021 = vst [vmem:[#allocation38_spill] sm:$0xff] %v2629_v0  ;;  %3022 = vst [vmem:[#allocation39_spill] sm:$0xff] %v2632_v11  ;;  %v2639_v62 = vadd.f32 %v417_v24, %v150_v22  ;;  %v2642_v31 = vadd.f32 %v490_v32, %v2572_v18  ;;  %v455_v0 = vadd.f32 %v2570_v17, %v2566_v15  ;;  %v99_v22 = vld [vmem:[#allocation10] sm:$0xff] }
 0x16d   :  { %3023 = vst [vmem:[#allocation40_spill] sm:$0xff] %v2634_v28  ;;  %3024 = vst [vmem:[#allocation41_spill] sm:$0xff] %v2637_v26  ;;  %v457_v11 = vadd.f32 %v456_v21, %v2572_v18 }
 0x16e   :  { %3025 = vst [vmem:[#allocation42_spill] sm:$0xff] %v2639_v62  ;;  %3026 = vst [vmem:[#allocation43_spill] sm:$0xff] %v2642_v31 }
 0x170   :  { %v761_v9 = vpop.f32.mrb[16].mxu0  ;;  %v802_v28 = vpop.f32.mrb[16].mxu1 }
 0x171   :  { %v809_v44 = vadd.f32 %v761_v9, %v382_v14  ;;  %v811_v23 = vadd.f32 %v802_v28, %v455_v0  ;;  %v763_v13 = vpop.f32.mrb[17].mxu0  ;;  %v804_v26 = vpop.f32.mrb[17].mxu1  ;;  %v3027_v14 = vmov 0  }
 0x172   :  { %v810_v12 = vadd.f32 %v763_v13, %v384_v7  ;;  %v812_v24 = vadd.f32 %v804_v26, %v457_v11  ;;  %v765_v62 = vpop.f32.mrb[18].mxu0  ;;  %v806_v10 = vpop.f32.mrb[18].mxu1 }
 0x173   :  { %v1804_v32 = vmul.f32 -1.442695, %v809_v44  ;;  %v766_v31 = vpop.f32.mrb[19].mxu0  ;;  %v807_v8 = vpop.f32.mrb[19].mxu1 }
 0x174   :  { %v1805_v16 = vmul.f32 -1.442695, %v810_v12  ;;  %v1806_v15 = vmul.f32 -1.442695, %v812_v24 }
 0x175   :  { %1941 = vpow2.f32 %v1804_v32 }
 0x176   :  { %1943 = vpow2.f32 %v1805_v16 }
 0x177   :  { %1945 = vpow2.f32 %v1806_v15 }
 0x178   :  { %1947 = vtanh.f32 %v811_v23 }
 0x17f   :  { %v1942_v17 = vpop.eup %1941 }
 0x180   :  { %v1944_v19 = vpop.eup %1943  ;;  %v816_v18 = vadd.f32 1.0, %v1942_v17 }
 0x181   :  { %v822_v20 = vadd.f32 1.0, %v1944_v19  ;;  %v1946_v0 = vpop.eup %1945 }
 0x182   :  { %1949 = vrcp.f32 %v816_v18  ;;  %v1948_v21 = vpop.eup %1947  ;;  %v829_v26 = vadd.f32 1.0, %v1946_v0 }
 0x183   :  { %1951 = vrcp.f32 %v822_v20 }
 0x184   :  { %1953 = vrcp.f32 %v829_v26 }
 0x18c   :  { %v1950_v28 = vpop.eup %1949 }
 0x18d   :  { %v1952_v10 = vpop.eup %1951  ;;  %v833_v62 = vmul.f32 %v1950_v28, %v1948_v21 }
 0x18e   :  { %v832_v8 = vmul.f32 %v1952_v10, %v99_v22  ;;  %v1954_v44 = vpop.eup %1953 }
 0x190   :  { %v2648_v12 = vadd.f32 %v833_v62, %v832_v8 }
 0x192   :  { %1955 = vtanh.f32 %v2648_v12 }
 0x19c   :  { %v1956_v11 = vpop.eup %1955 }
 0x19d   :  { %v836_v31 = vmul.f32 %v1956_v11, %v1954_v44 }
 0x19f   :  { %v837_v23 = vpack.c.bf16 %v836_v31, %v836_v31 }
 0x1a1   :  { %838 = vst [vmem:[#allocation14] sm:$0xf] %v837_v23  ;;  %879 = vmatmul.mubr.bf16.vlgmr.msra.gmra.mrb[20].mxu0 %v837_v23  ;;  %920 = vmatmul.mubr.bf16.vlgmr.msra.gmra.mrb[20].mxu1 %v837_v23 }
 0x1a2   :  { %967 = vmatpush1.bf16.msra.mxu0 %v2427_v36  ;;  %1008 = vmatpush1.bf16.msra.mxu1 %v2429_v37 }
 0x1a3   :  { %968 = vmatprep.subr.bf16.mxu0 %v2433_v38  ;;  %1009 = vmatprep.subr.bf16.mxu1 %v2435_v39 }
 0x1a4   :  { %998 = vmatprep.mubr.bf16.mxu0 %v3027_v14  ;;  %1039 = vmatprep.mubr.bf16.mxu1 %v3027_v14 }
 0x1a6   :  { %969 = vmatpush1.bf16.msra.mxu0 %v2437_v40  ;;  %1010 = vmatpush1.bf16.msra.mxu1 %v2441_v41 }
 0x1a7   :  { %970 = vmatprep.subr.bf16.mxu0 %v2445_v42  ;;  %1011 = vmatprep.subr.bf16.mxu1 %v2447_v43 }
 0x1aa   :  { %971 = vmatpush1.bf16.msra.mxu0 %v2451_v45  ;;  %1012 = vmatpush1.bf16.msra.mxu1 %v2453_v46 }
 0x1ab   :  { %972 = vmatprep.subr.bf16.mxu0 %v2457_v47  ;;  %1013 = vmatprep.subr.bf16.mxu1 %v2461_v48 }
 0x1ae   :  { %973 = vmatpush1.bf16.msra.mxu0 %v2463_v49  ;;  %1014 = vmatpush1.bf16.msra.mxu1 %v2465_v50 }
 0x1af   :  { %974 = vmatprep.subr.bf16.mxu0 %v2469_v51  ;;  %1015 = vmatprep.subr.bf16.mxu1 %v2473_v52 }
 0x1b2   :  { %975 = vmatpush1.bf16.msra.mxu0 %v2479_v54  ;;  %1016 = vmatpush1.bf16.msra.mxu1 %v2481_v55 }
 0x1b3   :  { %976 = vmatprep.subr.bf16.mxu0 %v2485_v56  ;;  %1017 = vmatprep.subr.bf16.mxu1 %v2487_v57 }
 0x1b6   :  { %977 = vmatpush1.bf16.msra.mxu0 %v2491_v58  ;;  %1018 = vmatpush1.bf16.msra.mxu1 %v2493_v59 }
 0x1b7   :  { %978 = vmatprep.subr.bf16.mxu0 %v2497_v60  ;;  %1019 = vmatprep.subr.bf16.mxu1 %v2499_v61 }
 0x1ba   :  { %979 = vmatpush1.bf16.msra.mxu0 %v2505_v63  ;;  %1020 = vmatpush1.bf16.msra.mxu1 %v2507_v1 }
 0x1bb   :  { %980 = vmatprep.subr.bf16.mxu0 %v2511_v2  ;;  %1021 = vmatprep.subr.bf16.mxu1 %v2513_v3 }
 0x1be   :  { %981 = vmatpush1.bf16.msra.mxu0 %v2517_v4  ;;  %1022 = vmatpush1.bf16.msra.mxu1 %v2519_v5 }
 0x1bf   :  { %1086 = vmatprep.subr.bf16.mxu0 %v2423_v33  ;;  %1127 = vmatprep.subr.bf16.mxu1 %v2425_v34 }
 0x274   :  { %v880_v7 = vpop.f32.mrb[20].mxu0  ;;  %v921_v9 = vpop.f32.mrb[20].mxu1 }
 0x275   :  { %v928_v13 = vadd.f32 %v880_v7, %v2574_v25  ;;  %v930_v24 = vadd.f32 %v921_v9, %v2577_v27  ;;  %v882_v32 = vpop.f32.mrb[21].mxu0  ;;  %v923_v16 = vpop.f32.mrb[21].mxu1 }
 0x276   :  { %v929_v15 = vadd.f32 %v882_v32, %v2579_v29  ;;  %v931_v17 = vadd.f32 %v923_v16, %v2582_v30  ;;  %v884_v19 = vpop.f32.mrb[22].mxu0  ;;  %v925_v18 = vpop.f32.mrb[22].mxu1 }
 0x277   :  { %v1807_v20 = vmul.f32 -1.442695, %v928_v13  ;;  %v885_v0 = vpop.f32.mrb[23].mxu0  ;;  %v926_v21 = vpop.f32.mrb[23].mxu1 }
 0x278   :  { %v1808_v22 = vmul.f32 -1.442695, %v929_v15  ;;  %v1809_v28 = vmul.f32 -1.442695, %v931_v17 }
 0x279   :  { %1957 = vpow2.f32 %v1807_v20  ;;  %v3028_v20 = vld [vmem:[#allocation23_spill] sm:$0xff] }
 0x27a   :  { %1959 = vpow2.f32 %v1808_v22 }
 0x27b   :  { %1961 = vpow2.f32 %v1809_v28 }
 0x27c   :  { %1963 = vtanh.f32 %v930_v24 }
 0x283   :  { %v1958_v10 = vpop.eup %1957 }
 0x284   :  { %v1960_v62 = vpop.eup %1959  ;;  %v935_v25 = vadd.f32 1.0, %v1958_v10 }
 0x285   :  { %v941_v27 = vadd.f32 1.0, %v1960_v62  ;;  %v1962_v29 = vpop.eup %1961 }
 0x286   :  { %1965 = vrcp.f32 %v935_v25  ;;  %v1964_v26 = vpop.eup %1963  ;;  %v948_v11 = vadd.f32 1.0, %v1962_v29 }
 0x287   :  { %1967 = vrcp.f32 %v941_v27 }
 0x288   :  { %1969 = vrcp.f32 %v948_v11 }
 0x290   :  { %v1966_v30 = vpop.eup %1965 }
 0x291   :  { %v1968_v8 = vpop.eup %1967  ;;  %v952_v44 = vmul.f32 %v1966_v30, %v1964_v26 }
 0x292   :  { %v951_v31 = vmul.f32 %v1968_v8, %v2648_v12  ;;  %v1970_v7 = vpop.eup %1969 }
 0x294   :  { %v2690_v23 = vadd.f32 %v952_v44, %v951_v31 }
 0x296   :  { %1971 = vtanh.f32 %v2690_v23 }
 0x2a0   :  { %v1972_v9 = vpop.eup %1971 }
 0x2a1   :  { %v955_v13 = vmul.f32 %v1972_v9, %v1970_v7 }
 0x2a3   :  { %v956_v24 = vpack.c.bf16 %v955_v13, %v955_v13 }
 0x2a5   :  { %958 = vst [vmem:[#allocation14 + $0x4] sm:$0xf] %v956_v24  ;;  %999 = vmatmul.mubr.bf16.vlgmr.msra.gmra.mrb[24].mxu0 %v956_v24  ;;  %1040 = vmatmul.mubr.bf16.vlgmr.msra.gmra.mrb[24].mxu1 %v956_v24 }
 0x2a6   :  { %1087 = vmatpush1.bf16.msra.mxu0 %v2427_v36  ;;  %1128 = vmatpush1.bf16.msra.mxu1 %v2429_v37 }
 0x2a7   :  { %1088 = vmatprep.subr.bf16.mxu0 %v2433_v38  ;;  %1129 = vmatprep.subr.bf16.mxu1 %v2435_v39 }
 0x2a8   :  { %1118 = vmatprep.mubr.bf16.mxu0 %v3027_v14  ;;  %1159 = vmatprep.mubr.bf16.mxu1 %v3027_v14 }
 0x2aa   :  { %1089 = vmatpush1.bf16.msra.mxu0 %v2437_v40  ;;  %1130 = vmatpush1.bf16.msra.mxu1 %v2441_v41 }
 0x2ab   :  { %1090 = vmatprep.subr.bf16.mxu0 %v2445_v42  ;;  %1131 = vmatprep.subr.bf16.mxu1 %v2447_v43 }
 0x2ae   :  { %1091 = vmatpush1.bf16.msra.mxu0 %v2451_v45  ;;  %1132 = vmatpush1.bf16.msra.mxu1 %v2453_v46 }
 0x2af   :  { %1092 = vmatprep.subr.bf16.mxu0 %v2457_v47  ;;  %1133 = vmatprep.subr.bf16.mxu1 %v2461_v48 }
 0x2b2   :  { %1093 = vmatpush1.bf16.msra.mxu0 %v2463_v49  ;;  %1134 = vmatpush1.bf16.msra.mxu1 %v2465_v50 }
 0x2b3   :  { %1094 = vmatprep.subr.bf16.mxu0 %v2469_v51  ;;  %1135 = vmatprep.subr.bf16.mxu1 %v2473_v52 }
 0x2b6   :  { %1095 = vmatpush1.bf16.msra.mxu0 %v2479_v54  ;;  %1136 = vmatpush1.bf16.msra.mxu1 %v2481_v55 }
 0x2b7   :  { %1096 = vmatprep.subr.bf16.mxu0 %v2485_v56  ;;  %1137 = vmatprep.subr.bf16.mxu1 %v2487_v57 }
 0x2ba   :  { %1097 = vmatpush1.bf16.msra.mxu0 %v2491_v58  ;;  %1138 = vmatpush1.bf16.msra.mxu1 %v2493_v59 }
 0x2bb   :  { %1098 = vmatprep.subr.bf16.mxu0 %v2497_v60  ;;  %1139 = vmatprep.subr.bf16.mxu1 %v2499_v61 }
 0x2be   :  { %1099 = vmatpush1.bf16.msra.mxu0 %v2505_v63  ;;  %1140 = vmatpush1.bf16.msra.mxu1 %v2507_v1 }
 0x2bf   :  { %1100 = vmatprep.subr.bf16.mxu0 %v2511_v2  ;;  %1141 = vmatprep.subr.bf16.mxu1 %v2513_v3 }
 0x2c2   :  { %1101 = vmatpush1.bf16.msra.mxu0 %v2517_v4  ;;  %1142 = vmatpush1.bf16.msra.mxu1 %v2519_v5 }
 0x2c3   :  { %1206 = vmatprep.subr.bf16.mxu0 %v2423_v33  ;;  %1247 = vmatprep.subr.bf16.mxu1 %v2425_v34 }
 0x378   :  { %v1000_v12 = vpop.f32.mrb[24].mxu0  ;;  %v1041_v32 = vpop.f32.mrb[24].mxu1 }
 0x379   :  { %v1048_v16 = vadd.f32 %v1000_v12, %v2584_v35  ;;  %v1050_v15 = vadd.f32 %v1041_v32, %v2587_v53  ;;  %v1002_v17 = vpop.f32.mrb[25].mxu0  ;;  %v1043_v19 = vpop.f32.mrb[25].mxu1 }
 0x37a   :  { %v1049_v18 = vadd.f32 %v1002_v17, %v2589_v6  ;;  %v1051_v0 = vadd.f32 %v1043_v19, %v3028_v20  ;;  %v1004_v21 = vpop.f32.mrb[26].mxu0  ;;  %v1045_v22 = vpop.f32.mrb[26].mxu1  ;;  %v3030_v19 = vld [vmem:[#allocation25_spill] sm:$0xff] }
 0x37b   :  { %v1810_v28 = vmul.f32 -1.442695, %v1048_v16  ;;  %v1005_v10 = vpop.f32.mrb[27].mxu0  ;;  %v1046_v62 = vpop.f32.mrb[27].mxu1  ;;  %v3031_v21 = vld [vmem:[#allocation26_spill] sm:$0xff] }
 0x37c   :  { %v1811_v25 = vmul.f32 -1.442695, %v1049_v18  ;;  %v1812_v27 = vmul.f32 -1.442695, %v1051_v0 }
 0x37d   :  { %1973 = vpow2.f32 %v1810_v28  ;;  %v3032_v28 = vld [vmem:[#allocation27_spill] sm:$0xff] }
 0x37e   :  { %1975 = vpow2.f32 %v1811_v25 }
 0x37f   :  { %1977 = vpow2.f32 %v1812_v27 }
 0x380   :  { %1979 = vtanh.f32 %v1050_v15  ;;  %v3029_v15 = vld [vmem:[#allocation24_spill] sm:$0xff] }
 0x387   :  { %v1974_v29 = vpop.eup %1973 }
 0x388   :  { %v1976_v26 = vpop.eup %1975  ;;  %v1055_v35 = vadd.f32 1.0, %v1974_v29 }
 0x389   :  { %v1061_v53 = vadd.f32 1.0, %v1976_v26  ;;  %v1978_v6 = vpop.eup %1977 }
 0x38a   :  { %1981 = vrcp.f32 %v1055_v35  ;;  %v1980_v30 = vpop.eup %1979  ;;  %v1068_v31 = vadd.f32 1.0, %v1978_v6 }
 0x38b   :  { %1983 = vrcp.f32 %v1061_v53 }
 0x38c   :  { %1985 = vrcp.f32 %v1068_v31 }
 0x394   :  { %v1982_v8 = vpop.eup %1981 }
 0x395   :  { %v1984_v44 = vpop.eup %1983  ;;  %v1072_v11 = vmul.f32 %v1982_v8, %v1980_v30 }
 0x396   :  { %v1071_v7 = vmul.f32 %v1984_v44, %v2690_v23  ;;  %v1986_v13 = vpop.eup %1985 }
 0x398   :  { %v2732_v9 = vadd.f32 %v1072_v11, %v1071_v7 }
 0x39a   :  { %1987 = vtanh.f32 %v2732_v9 }
 0x3a4   :  { %v1988_v24 = vpop.eup %1987 }
 0x3a5   :  { %v1075_v12 = vmul.f32 %v1988_v24, %v1986_v13 }
 0x3a7   :  { %v1076_v32 = vpack.c.bf16 %v1075_v12, %v1075_v12 }
 0x3a9   :  { %1078 = vst [vmem:[#allocation14 + $0x8] sm:$0xf] %v1076_v32  ;;  %1119 = vmatmul.mubr.bf16.vlgmr.msra.gmra.mrb[28].mxu0 %v1076_v32  ;;  %1160 = vmatmul.mubr.bf16.vlgmr.msra.gmra.mrb[28].mxu1 %v1076_v32 }
 0x3aa   :  { %1207 = vmatpush1.bf16.msra.mxu0 %v2427_v36  ;;  %1248 = vmatpush1.bf16.msra.mxu1 %v2429_v37 }
 0x3ab   :  { %1208 = vmatprep.subr.bf16.mxu0 %v2433_v38  ;;  %1249 = vmatprep.subr.bf16.mxu1 %v2435_v39 }
 0x3ac   :  { %1238 = vmatprep.mubr.bf16.mxu0 %v3027_v14  ;;  %1279 = vmatprep.mubr.bf16.mxu1 %v3027_v14 }
 0x3ae   :  { %1209 = vmatpush1.bf16.msra.mxu0 %v2437_v40  ;;  %1250 = vmatpush1.bf16.msra.mxu1 %v2441_v41 }
 0x3af   :  { %1210 = vmatprep.subr.bf16.mxu0 %v2445_v42  ;;  %1251 = vmatprep.subr.bf16.mxu1 %v2447_v43 }
 0x3b2   :  { %1211 = vmatpush1.bf16.msra.mxu0 %v2451_v45  ;;  %1252 = vmatpush1.bf16.msra.mxu1 %v2453_v46 }
 0x3b3   :  { %1212 = vmatprep.subr.bf16.mxu0 %v2457_v47  ;;  %1253 = vmatprep.subr.bf16.mxu1 %v2461_v48 }
 0x3b6   :  { %1213 = vmatpush1.bf16.msra.mxu0 %v2463_v49  ;;  %1254 = vmatpush1.bf16.msra.mxu1 %v2465_v50 }
 0x3b7   :  { %1214 = vmatprep.subr.bf16.mxu0 %v2469_v51  ;;  %1255 = vmatprep.subr.bf16.mxu1 %v2473_v52 }
 0x3ba   :  { %1215 = vmatpush1.bf16.msra.mxu0 %v2479_v54  ;;  %1256 = vmatpush1.bf16.msra.mxu1 %v2481_v55 }
 0x3bb   :  { %1216 = vmatprep.subr.bf16.mxu0 %v2485_v56  ;;  %1257 = vmatprep.subr.bf16.mxu1 %v2487_v57 }
 0x3be   :  { %1217 = vmatpush1.bf16.msra.mxu0 %v2491_v58  ;;  %1258 = vmatpush1.bf16.msra.mxu1 %v2493_v59 }
 0x3bf   :  { %1218 = vmatprep.subr.bf16.mxu0 %v2497_v60  ;;  %1259 = vmatprep.subr.bf16.mxu1 %v2499_v61 }
 0x3c2   :  { %1219 = vmatpush1.bf16.msra.mxu0 %v2505_v63  ;;  %1260 = vmatpush1.bf16.msra.mxu1 %v2507_v1 }
 0x3c3   :  { %1220 = vmatprep.subr.bf16.mxu0 %v2511_v2  ;;  %1261 = vmatprep.subr.bf16.mxu1 %v2513_v3 }
 0x3c6   :  { %1221 = vmatpush1.bf16.msra.mxu0 %v2517_v4  ;;  %1262 = vmatpush1.bf16.msra.mxu1 %v2519_v5 }
 0x3c7   :  { %1326 = vmatprep.subr.bf16.mxu0 %v2423_v33  ;;  %1367 = vmatprep.subr.bf16.mxu1 %v2425_v34 }
 0x47c   :  { %v1120_v23 = vpop.f32.mrb[28].mxu0  ;;  %v1161_v16 = vpop.f32.mrb[28].mxu1 }
 0x47d   :  { %v1168_v17 = vadd.f32 %v1120_v23, %v3029_v15  ;;  %v1170_v18 = vadd.f32 %v1161_v16, %v3030_v19  ;;  %v1122_v20 = vpop.f32.mrb[29].mxu0  ;;  %v1163_v0 = vpop.f32.mrb[29].mxu1 }
 0x47e   :  { %v1169_v22 = vadd.f32 %v1122_v20, %v3031_v21  ;;  %v1171_v10 = vadd.f32 %v1163_v0, %v3032_v28  ;;  %v1124_v62 = vpop.f32.mrb[30].mxu0  ;;  %v1165_v25 = vpop.f32.mrb[30].mxu1 }
 0x47f   :  { %v1813_v27 = vmul.f32 -1.442695, %v1168_v17  ;;  %v1125_v29 = vpop.f32.mrb[31].mxu0  ;;  %v1166_v26 = vpop.f32.mrb[31].mxu1 }
 0x480   :  { %v1814_v33 = vmul.f32 -1.442695, %v1169_v22  ;;  %v1815_v34 = vmul.f32 -1.442695, %v1171_v10 }
 0x481   :  { %1989 = vpow2.f32 %v1813_v27 }
 0x482   :  { %1991 = vpow2.f32 %v1814_v33  ;;  %v2823_v33 = vld [vmem:[#allocation13] ss:$16 sps:$4 sm:$0xff]  }
 0x483   :  { %1993 = vpow2.f32 %v1815_v34  ;;  %v2826_v34 = vld [vmem:[#allocation13 + $0x8] ss:$16 sps:$4 sm:$0xff]  }
 0x484   :  { %1995 = vtanh.f32 %v1170_v18 }
 0x48b   :  { %v1990_v35 = vpop.eup %1989 }
 0x48c   :  { %v1992_v53 = vpop.eup %1991  ;;  %v1175_v6 = vadd.f32 1.0, %v1990_v35  ;;  %v2829_v35 = vld [vmem:[#allocation13 + $0x24] ss:$16 sps:$4 sm:$0xff]  }
 0x48d   :  { %v1181_v30 = vadd.f32 1.0, %v1992_v53  ;;  %v1994_v8 = vpop.eup %1993  ;;  %v2832_v53 = vld [vmem:[#allocation13 + $0x2c] ss:$16 sps:$4 sm:$0xff]  }
 0x48e   :  { %1997 = vrcp.f32 %v1175_v6  ;;  %v1996_v44 = vpop.eup %1995  ;;  %v1188_v13 = vadd.f32 1.0, %v1994_v8  ;;  %v2837_v6 = vld [vmem:[#allocation13 + $0x20] ss:$16 sps:$4 sm:$0xff]   ;;  %v2843_v8 = vld [vmem:[#allocation13 + $0x44] ss:$16 sps:$4 sm:$0xff]  }
 0x48f   :  { %1999 = vrcp.f32 %v1181_v30  ;;  %v2840_v30 = vld [vmem:[#allocation13 + $0x28] ss:$16 sps:$4 sm:$0xff]  }
 0x490   :  { %2001 = vrcp.f32 %v1188_v13  ;;  %v2858_v13 = vld [vmem:[#allocation13 + $0x6c] ss:$16 sps:$4 sm:$0xff]  }
 0x498   :  { %v1998_v11 = vpop.eup %1997 }
 0x499   :  { %v2000_v31 = vpop.eup %1999  ;;  %v1192_v7 = vmul.f32 %v1998_v11, %v1996_v44  ;;  %v2846_v44 = vld [vmem:[#allocation13 + $0x4c] ss:$16 sps:$4 sm:$0xff]   ;;  %v2849_v11 = vld [vmem:[#allocation13 + $0x40] ss:$16 sps:$4 sm:$0xff]  }
 0x49a   :  { %v1191_v24 = vmul.f32 %v2000_v31, %v2732_v9  ;;  %v2002_v32 = vpop.eup %2001  ;;  %v2852_v31 = vld [vmem:[#allocation13 + $0x48] ss:$16 sps:$4 sm:$0xff]  }
 0x49c   :  { %v2774_v12 = vadd.f32 %v1192_v7, %v1191_v24  ;;  %v2855_v7 = vld [vmem:[#allocation13 + $0x64] ss:$16 sps:$4 sm:$0xff]   ;;  %v2861_v24 = vld [vmem:[#allocation13 + $0x60] ss:$16 sps:$4 sm:$0xff]  }
 0x49e   :  { %2003 = vtanh.f32 %v2774_v12 }
 0x4a8   :  { %v2004_v23 = vpop.eup %2003 }
 0x4a9   :  { %v1195_v16 = vmul.f32 %v2004_v23, %v2002_v32  ;;  %v2867_v32 = vld [vmem:[#allocation13 + $0x84] ss:$16 sps:$4 sm:$0xff]   ;;  %v2870_v23 = vld [vmem:[#allocation13 + $0x8c] ss:$16 sps:$4 sm:$0xff]  }
 0x4ab   :  { %v1196_v15 = vpack.c.bf16 %v1195_v16, %v1195_v16  ;;  %v2873_v16 = vld [vmem:[#allocation13 + $0x80] ss:$16 sps:$4 sm:$0xff]  }
 0x4ad   :  { %1198 = vst [vmem:[#allocation14 + $0xc] sm:$0xf] %v1196_v15  ;;  %1239 = vmatmul.mubr.bf16.vlgmr.msra.gmra.mrb[32].mxu0 %v1196_v15  ;;  %1280 = vmatmul.mubr.bf16.vlgmr.msra.gmra.mrb[32].mxu1 %v1196_v15  ;;  %v2876_v15 = vld [vmem:[#allocation13 + $0x88] ss:$16 sps:$4 sm:$0xff]  }
 0x4ae   :  { %1327 = vmatpush1.bf16.msra.mxu0 %v2427_v36  ;;  %1368 = vmatpush1.bf16.msra.mxu1 %v2429_v37  ;;  %v2809_v36 = vld [vmem:[#allocation13 + $0x4] ss:$16 sps:$4 sm:$0xff]   ;;  %v2812_v37 = vld [vmem:[#allocation13 + $0xc] ss:$16 sps:$4 sm:$0xff]  }
 0x4af   :  { %1328 = vmatprep.subr.bf16.mxu0 %v2433_v38  ;;  %1369 = vmatprep.subr.bf16.mxu1 %v2435_v39 }
 0x4b0   :  { %1358 = vmatprep.mubr.bf16.mxu0 %v3027_v14  ;;  %1399 = vmatprep.mubr.bf16.mxu1 %v3027_v14 }
 0x4b2   :  { %1329 = vmatpush1.bf16.msra.mxu0 %v2437_v40  ;;  %1370 = vmatpush1.bf16.msra.mxu1 %v2441_v41  ;;  %v3033_v40 = vld [vmem:[#allocation28_spill] sm:$0xff] }
 0x4b3   :  { %1330 = vmatprep.subr.bf16.mxu0 %v2445_v42  ;;  %1371 = vmatprep.subr.bf16.mxu1 %v2447_v43  ;;  %v3034_v42 = vld [vmem:[#allocation29_spill] sm:$0xff] }
 0x4b6   :  { %1331 = vmatpush1.bf16.msra.mxu0 %v2451_v45  ;;  %1372 = vmatpush1.bf16.msra.mxu1 %v2453_v46 }
 0x4b7   :  { %1332 = vmatprep.subr.bf16.mxu0 %v2457_v47  ;;  %1373 = vmatprep.subr.bf16.mxu1 %v2461_v48  ;;  %v3035_v47 = vld [vmem:[#allocation30_spill] sm:$0xff] }
 0x4ba   :  { %1333 = vmatpush1.bf16.msra.mxu0 %v2463_v49  ;;  %1374 = vmatpush1.bf16.msra.mxu1 %v2465_v50  ;;  %v3036_v49 = vld [vmem:[#allocation31_spill] sm:$0xff] }
 0x4bb   :  { %1334 = vmatprep.subr.bf16.mxu0 %v2469_v51  ;;  %1375 = vmatprep.subr.bf16.mxu1 %v2473_v52 }
 0x4be   :  { %1335 = vmatpush1.bf16.msra.mxu0 %v2479_v54  ;;  %1376 = vmatpush1.bf16.msra.mxu1 %v2481_v55 }
 0x4bf   :  { %1336 = vmatprep.subr.bf16.mxu0 %v2485_v56  ;;  %1377 = vmatprep.subr.bf16.mxu1 %v2487_v57 }
 0x4c2   :  { %1337 = vmatpush1.bf16.msra.mxu0 %v2491_v58  ;;  %1378 = vmatpush1.bf16.msra.mxu1 %v2493_v59 }
 0x4c3   :  { %1338 = vmatprep.subr.bf16.mxu0 %v2497_v60  ;;  %1379 = vmatprep.subr.bf16.mxu1 %v2499_v61 }
 0x4c6   :  { %1339 = vmatpush1.bf16.msra.mxu0 %v2505_v63  ;;  %1380 = vmatpush1.bf16.msra.mxu1 %v2507_v1 }
 0x4c7   :  { %1340 = vmatprep.subr.bf16.mxu0 %v2511_v2  ;;  %1381 = vmatprep.subr.bf16.mxu1 %v2513_v3 }
 0x4ca   :  { %1341 = vmatpush1.bf16.msra.mxu0 %v2517_v4  ;;  %1382 = vmatpush1.bf16.msra.mxu1 %v2519_v5 }
 0x4cb   :  { %1446 = vmatprep.subr.bf16.mxu0 %v2809_v36  ;;  %1487 = vmatprep.subr.bf16.mxu1 %v2812_v37 }
 0x580   :  { %v1240_v38 = vpop.f32.mrb[32].mxu0  ;;  %v1281_v39 = vpop.f32.mrb[32].mxu1 }
 0x581   :  { %v1288_v41 = vadd.f32 %v1240_v38, %v3033_v40  ;;  %v1290_v43 = vadd.f32 %v1281_v39, %v3034_v42  ;;  %v1242_v45 = vpop.f32.mrb[33].mxu0  ;;  %v1283_v46 = vpop.f32.mrb[33].mxu1  ;;  %v2879_v38 = vld [vmem:[#allocation13 + $0xa4] ss:$16 sps:$4 sm:$0xff]   ;;  %v2882_v39 = vld [vmem:[#allocation13 + $0xac] ss:$16 sps:$4 sm:$0xff]  }
 0x582   :  { %v1289_v48 = vadd.f32 %v1242_v45, %v3035_v47  ;;  %v1291_v50 = vadd.f32 %v1283_v46, %v3036_v49  ;;  %v1244_v51 = vpop.f32.mrb[34].mxu0  ;;  %v1285_v52 = vpop.f32.mrb[34].mxu1  ;;  %v2885_v40 = vld [vmem:[#allocation13 + $0xa0] ss:$16 sps:$4 sm:$0xff]   ;;  %v3039_v47 = vld [vmem:[#allocation34_spill] sm:$0xff] }
 0x583   :  { %v1816_v54 = vmul.f32 -1.442695, %v1288_v41  ;;  %v1245_v55 = vpop.f32.mrb[35].mxu0  ;;  %v1286_v56 = vpop.f32.mrb[35].mxu1  ;;  %v2888_v41 = vld [vmem:[#allocation13 + $0xa8] ss:$16 sps:$4 sm:$0xff]  }
 0x584   :  { %v1817_v57 = vmul.f32 -1.442695, %v1289_v48  ;;  %v1818_v58 = vmul.f32 -1.442695, %v1291_v50  ;;  %v3038_v45 = vld [vmem:[#allocation33_spill] sm:$0xff]  ;;  %v3040_v48 = vld [vmem:[#allocation35_spill] sm:$0xff] }
 0x585   :  { %2005 = vpow2.f32 %v1816_v54 }
 0x586   :  { %2007 = vpow2.f32 %v1817_v57 }
 0x587   :  { %2009 = vpow2.f32 %v1818_v58 }
 0x588   :  { %2011 = vtanh.f32 %v1290_v43  ;;  %v3037_v43 = vld [vmem:[#allocation32_spill] sm:$0xff] }
 0x58f   :  { %v2006_v59 = vpop.eup %2005 }
 0x590   :  { %v2008_v9 = vpop.eup %2007  ;;  %v1295_v17 = vadd.f32 1.0, %v2006_v59 }
 0x591   :  { %v1301_v19 = vadd.f32 1.0, %v2008_v9  ;;  %v2010_v18 = vpop.eup %2009 }
 0x592   :  { %2013 = vrcp.f32 %v1295_v17  ;;  %v2012_v20 = vpop.eup %2011  ;;  %v1308_v28 = vadd.f32 1.0, %v2010_v18 }
 0x593   :  { %2015 = vrcp.f32 %v1301_v19 }
 0x594   :  { %2017 = vrcp.f32 %v1308_v28 }
 0x59c   :  { %v2014_v0 = vpop.eup %2013 }
 0x59d   :  { %v2016_v21 = vpop.eup %2015  ;;  %v1312_v22 = vmul.f32 %v2014_v0, %v2012_v20 }
 0x59e   :  { %v1311_v10 = vmul.f32 %v2016_v21, %v2774_v12  ;;  %v2018_v25 = vpop.eup %2017  ;;  %v2864_v12 = vld [vmem:[#allocation13 + $0x68] ss:$16 sps:$4 sm:$0xff]  }
 0x5a0   :  { %v2820_v62 = vadd.f32 %v1312_v22, %v1311_v10  ;;  %v2094_v10 = vld [vmem:[#allocation13 + $0xcc] ss:$16 sps:$4 sm:$0xff]  }
 0x5a2   :  { %2019 = vtanh.f32 %v2820_v62 }
 0x5ac   :  { %v2020_v27 = vpop.eup %2019 }
 0x5ad   :  { %v1315_v29 = vmul.f32 %v2020_v27, %v2018_v25  ;;  %v2096_v25 = vld [vmem:[#allocation13 + $0xc8] ss:$16 sps:$4 sm:$0xff]   ;;  %v2097_v27 = vld [vmem:[#allocation13 + $0xe4] ss:$16 sps:$4 sm:$0xff]  }
 0x5af   :  { %v1316_v26 = vpack.c.bf16 %v1315_v29, %v1315_v29  ;;  %v2098_v29 = vld [vmem:[#allocation13 + $0xec] ss:$16 sps:$4 sm:$0xff]  }
 0x5b1   :  { %1318 = vst [vmem:[#allocation14 + $0x10] sm:$0xf] %v1316_v26  ;;  %1359 = vmatmul.mubr.bf16.vlgmr.msra.gmra.mrb[36].mxu0 %v1316_v26  ;;  %1400 = vmatmul.mubr.bf16.vlgmr.msra.gmra.mrb[36].mxu1 %v1316_v26  ;;  %v2099_v26 = vld [vmem:[#allocation13 + $0xe0] ss:$16 sps:$4 sm:$0xff]  }
 0x5b2   :  { %1447 = vmatpush1.bf16.msra.mxu0 %v2823_v33  ;;  %1488 = vmatpush1.bf16.msra.mxu1 %v2826_v34 }
 0x5b3   :  { %1448 = vmatprep.subr.bf16.mxu0 %v2829_v35  ;;  %1489 = vmatprep.subr.bf16.mxu1 %v2832_v53 }
 0x5b4   :  { %1478 = vmatprep.mubr.bf16.mxu0 %v3027_v14  ;;  %1519 = vmatprep.mubr.bf16.mxu1 %v3027_v14 }
 0x5b6   :  { %1449 = vmatpush1.bf16.msra.mxu0 %v2837_v6  ;;  %1490 = vmatpush1.bf16.msra.mxu1 %v2840_v30 }
 0x5b7   :  { %1450 = vmatprep.subr.bf16.mxu0 %v2843_v8  ;;  %1491 = vmatprep.subr.bf16.mxu1 %v2846_v44 }
 0x5ba   :  { %1451 = vmatpush1.bf16.msra.mxu0 %v2849_v11  ;;  %1492 = vmatpush1.bf16.msra.mxu1 %v2852_v31 }
 0x5bb   :  { %1452 = vmatprep.subr.bf16.mxu0 %v2855_v7  ;;  %1493 = vmatprep.subr.bf16.mxu1 %v2858_v13 }
 0x5be   :  { %1453 = vmatpush1.bf16.msra.mxu0 %v2861_v24  ;;  %1494 = vmatpush1.bf16.msra.mxu1 %v2864_v12 }
 0x5bf   :  { %1454 = vmatprep.subr.bf16.mxu0 %v2867_v32  ;;  %1495 = vmatprep.subr.bf16.mxu1 %v2870_v23 }
 0x5c2   :  { %1455 = vmatpush1.bf16.msra.mxu0 %v2873_v16  ;;  %1496 = vmatpush1.bf16.msra.mxu1 %v2876_v15 }
 0x5c3   :  { %1456 = vmatprep.subr.bf16.mxu0 %v2879_v38  ;;  %1497 = vmatprep.subr.bf16.mxu1 %v2882_v39 }
 0x5c6   :  { %1457 = vmatpush1.bf16.msra.mxu0 %v2885_v40  ;;  %1498 = vmatpush1.bf16.msra.mxu1 %v2888_v41 }
 0x5c7   :  { %1458 = vmatprep.subr.bf16.mxu0 %v2497_v60  ;;  %1499 = vmatprep.subr.bf16.mxu1 %v2499_v61 }
 0x5ca   :  { %1459 = vmatpush1.bf16.msra.mxu0 %v2505_v63  ;;  %1500 = vmatpush1.bf16.msra.mxu1 %v2507_v1 }
 0x5cb   :  { %1460 = vmatprep.subr.bf16.mxu0 %v2511_v2  ;;  %1501 = vmatprep.subr.bf16.mxu1 %v2513_v3 }
 0x5ce   :  { %1461 = vmatpush1.bf16.msra.mxu0 %v2517_v4  ;;  %1502 = vmatpush1.bf16.msra.mxu1 %v2519_v5 }
 0x5cf   :  { %1566 = vmatprep.subr.bf16.mxu0 %v2809_v36  ;;  %1607 = vmatprep.subr.bf16.mxu1 %v2812_v37 }
 0x684   :  { %v1360_v42 = vpop.f32.mrb[36].mxu0  ;;  %v1401_v60 = vpop.f32.mrb[36].mxu1 }
 0x685   :  { %v1408_v61 = vadd.f32 %v1360_v42, %v3037_v43  ;;  %v1410_v63 = vadd.f32 %v1401_v60, %v3038_v45  ;;  %v1362_v46 = vpop.f32.mrb[37].mxu0  ;;  %v1403_v1 = vpop.f32.mrb[37].mxu1 }
 0x686   :  { %v1409_v2 = vadd.f32 %v1362_v46, %v3039_v47  ;;  %v1411_v3 = vadd.f32 %v1403_v1, %v3040_v48  ;;  %v1364_v49 = vpop.f32.mrb[38].mxu0  ;;  %v1405_v4 = vpop.f32.mrb[38].mxu1 }
 0x687   :  { %v1819_v50 = vmul.f32 -1.442695, %v1408_v61  ;;  %v1365_v5 = vpop.f32.mrb[39].mxu0  ;;  %v1406_v51 = vpop.f32.mrb[39].mxu1 }
 0x688   :  { %v1820_v36 = vmul.f32 -1.442695, %v1409_v2  ;;  %v1821_v37 = vmul.f32 -1.442695, %v1411_v3  ;;  %v3045_v51 = vld [vmem:[#allocation40_spill] sm:$0xff] }
 0x689   :  { %2021 = vpow2.f32 %v1819_v50 }
 0x68a   :  { %2023 = vpow2.f32 %v1820_v36 }
 0x68b   :  { %2025 = vpow2.f32 %v1821_v37  ;;  %v3046_v37 = vld [vmem:[#allocation41_spill] sm:$0xff] }
 0x68c   :  { %2027 = vtanh.f32 %v1410_v63 }
 0x693   :  { %v2022_v52 = vpop.eup %2021 }
 0x694   :  { %v2024_v54 = vpop.eup %2023  ;;  %v1415_v55 = vadd.f32 1.0, %v2022_v52 }
 0x695   :  { %v1421_v56 = vadd.f32 1.0, %v2024_v54  ;;  %v2026_v57 = vpop.eup %2025 }
 0x696   :  { %2029 = vrcp.f32 %v1415_v55  ;;  %v2028_v58 = vpop.eup %2027  ;;  %v1428_v19 = vadd.f32 1.0, %v2026_v57 }
 0x697   :  { %2031 = vrcp.f32 %v1421_v56  ;;  %v3047_v56 = vld [vmem:[#allocation42_spill] sm:$0xff] }
 0x698   :  { %2033 = vrcp.f32 %v1428_v19 }
 0x6a0   :  { %v2030_v59 = vpop.eup %2029 }
 0x6a1   :  { %v2032_v9 = vpop.eup %2031  ;;  %v1432_v17 = vmul.f32 %v2030_v59, %v2028_v58  ;;  %v3048_v58 = vld [vmem:[#allocation43_spill] sm:$0xff] }
 0x6a2   :  { %v1431_v18 = vmul.f32 %v2032_v9, %v2820_v62  ;;  %v2034_v0 = vpop.eup %2033  ;;  %v2095_v62 = vld [vmem:[#allocation13 + $0xc0] ss:$16 sps:$4 sm:$0xff]  }
 0x6a4   :  { %v2906_v20 = vadd.f32 %v1432_v17, %v1431_v18 }
 0x6a6   :  { %2035 = vtanh.f32 %v2906_v20 }
 0x6b0   :  { %v2036_v21 = vpop.eup %2035 }
 0x6b1   :  { %v1435_v22 = vmul.f32 %v2036_v21, %v2034_v0 }
 0x6b3   :  { %v1436_v28 = vpack.c.bf16 %v1435_v22, %v1435_v22 }
 0x6b5   :  { %1438 = vst [vmem:[#allocation14 + $0x14] sm:$0xf] %v1436_v28  ;;  %1479 = vmatmul.mubr.bf16.vlgmr.msra.gmra.mrb[40].mxu0 %v1436_v28  ;;  %1520 = vmatmul.mubr.bf16.vlgmr.msra.gmra.mrb[40].mxu1 %v1436_v28 }
 0x6b6   :  { %1567 = vmatpush1.bf16.msra.mxu0 %v2823_v33  ;;  %1608 = vmatpush1.bf16.msra.mxu1 %v2826_v34  ;;  %v2100_v33 = vld [vmem:[#allocation13 + $0xe8] ss:$16 sps:$4 sm:$0xff]  }
 0x6b7   :  { %1568 = vmatprep.subr.bf16.mxu0 %v2829_v35  ;;  %1609 = vmatprep.subr.bf16.mxu1 %v2832_v53  ;;  %v3041_v53 = vld [vmem:[#allocation36_spill] sm:$0xff] }
 0x6b8   :  { %1598 = vmatprep.mubr.bf16.mxu0 %v3027_v14  ;;  %1639 = vmatprep.mubr.bf16.mxu1 %v3027_v14  ;;  %v2093_v14 = vld [vmem:[#allocation13 + $0xc4] ss:$16 sps:$4 sm:$0xff]  }
 0x6ba   :  { %1569 = vmatpush1.bf16.msra.mxu0 %v2837_v6  ;;  %1610 = vmatpush1.bf16.msra.mxu1 %v2840_v30  ;;  %v3042_v30 = vld [vmem:[#allocation37_spill] sm:$0xff] }
 0x6bb   :  { %1570 = vmatprep.subr.bf16.mxu0 %v2843_v8  ;;  %1611 = vmatprep.subr.bf16.mxu1 %v2846_v44 }
 0x6be   :  { %1571 = vmatpush1.bf16.msra.mxu0 %v2849_v11  ;;  %1612 = vmatpush1.bf16.msra.mxu1 %v2852_v31  ;;  %v3043_v31 = vld [vmem:[#allocation38_spill] sm:$0xff] }
 0x6bf   :  { %1572 = vmatprep.subr.bf16.mxu0 %v2855_v7  ;;  %1613 = vmatprep.subr.bf16.mxu1 %v2858_v13  ;;  %v3044_v13 = vld [vmem:[#allocation39_spill] sm:$0xff] }
 0x6c2   :  { %1573 = vmatpush1.bf16.msra.mxu0 %v2861_v24  ;;  %1614 = vmatpush1.bf16.msra.mxu1 %v2864_v12 }
 0x6c3   :  { %1574 = vmatprep.subr.bf16.mxu0 %v2867_v32  ;;  %1615 = vmatprep.subr.bf16.mxu1 %v2870_v23 }
 0x6c6   :  { %1575 = vmatpush1.bf16.msra.mxu0 %v2873_v16  ;;  %1616 = vmatpush1.bf16.msra.mxu1 %v2876_v15 }
 0x6c7   :  { %1576 = vmatprep.subr.bf16.mxu0 %v2879_v38  ;;  %1617 = vmatprep.subr.bf16.mxu1 %v2882_v39 }
 0x6ca   :  { %1577 = vmatpush1.bf16.msra.mxu0 %v2885_v40  ;;  %1618 = vmatpush1.bf16.msra.mxu1 %v2888_v41 }
 0x6cb   :  { %1578 = vmatprep.subr.bf16.mxu0 %v2093_v14  ;;  %1619 = vmatprep.subr.bf16.mxu1 %v2094_v10 }
 0x6ce   :  { %1579 = vmatpush1.bf16.msra.mxu0 %v2095_v62  ;;  %1620 = vmatpush1.bf16.msra.mxu1 %v2096_v25 }
 0x6cf   :  { %1580 = vmatprep.subr.bf16.mxu0 %v2097_v27  ;;  %1621 = vmatprep.subr.bf16.mxu1 %v2098_v29 }
 0x6d2   :  { %1581 = vmatpush1.bf16.msra.mxu0 %v2099_v26  ;;  %1622 = vmatpush1.bf16.msra.mxu1 %v2100_v33 }
 0x788   :  { %v1480_v34 = vpop.f32.mrb[40].mxu0  ;;  %v1521_v35 = vpop.f32.mrb[40].mxu1 }
 0x789   :  { %v1528_v6 = vadd.f32 %v1480_v34, %v3041_v53  ;;  %v1530_v8 = vadd.f32 %v1521_v35, %v3042_v30  ;;  %v1482_v44 = vpop.f32.mrb[41].mxu0  ;;  %v1523_v11 = vpop.f32.mrb[41].mxu1 }
 0x78a   :  { %v1529_v7 = vadd.f32 %v1482_v44, %v3043_v31  ;;  %v1531_v24 = vadd.f32 %v1523_v11, %v3044_v13  ;;  %v1484_v12 = vpop.f32.mrb[42].mxu0  ;;  %v1525_v32 = vpop.f32.mrb[42].mxu1 }
 0x78b   :  { %v1822_v23 = vmul.f32 -1.442695, %v1528_v6  ;;  %v1485_v16 = vpop.f32.mrb[43].mxu0  ;;  %v1526_v15 = vpop.f32.mrb[43].mxu1 }
 0x78c   :  { %v1823_v38 = vmul.f32 -1.442695, %v1529_v7  ;;  %v1824_v39 = vmul.f32 -1.442695, %v1531_v24 }
 0x78d   :  { %2037 = vpow2.f32 %v1822_v23 }
 0x78e   :  { %2039 = vpow2.f32 %v1823_v38 }
 0x78f   :  { %2041 = vpow2.f32 %v1824_v39 }
 0x790   :  { %2043 = vtanh.f32 %v1530_v8 }
 0x797   :  { %v2038_v40 = vpop.eup %2037 }
 0x798   :  { %v2040_v41 = vpop.eup %2039  ;;  %v1535_v42 = vadd.f32 1.0, %v2038_v40 }
 0x799   :  { %v1541_v60 = vadd.f32 1.0, %v2040_v41  ;;  %v2042_v43 = vpop.eup %2041 }
 0x79a   :  { %2045 = vrcp.f32 %v1535_v42  ;;  %v2044_v61 = vpop.eup %2043  ;;  %v1548_v1 = vadd.f32 1.0, %v2042_v43 }
 0x79b   :  { %2047 = vrcp.f32 %v1541_v60 }
 0x79c   :  { %2049 = vrcp.f32 %v1548_v1 }
 0x7a4   :  { %v2046_v45 = vpop.eup %2045 }
 0x7a5   :  { %v2048_v63 = vpop.eup %2047  ;;  %v1552_v46 = vmul.f32 %v2046_v45, %v2044_v61 }
 0x7a6   :  { %v1551_v47 = vmul.f32 %v2048_v63, %v2906_v20  ;;  %v2050_v48 = vpop.eup %2049 }
 0x7a8   :  { %v1553_v2 = vadd.f32 %v1552_v46, %v1551_v47 }
 0x7aa   :  { %2051 = vtanh.f32 %v1553_v2 }
 0x7b4   :  { %v2052_v3 = vpop.eup %2051 }
 0x7b5   :  { %v1555_v49 = vmul.f32 %v2052_v3, %v2050_v48 }
 0x7b7   :  { %v1556_v4 = vpack.c.bf16 %v1555_v49, %v1555_v49 }
 0x7b9   :  { %1558 = vst [vmem:[#allocation14 + $0x18] sm:$0xf] %v1556_v4  ;;  %1599 = vmatmul.mubr.bf16.vlgmr.msra.gmra.mrb[44].mxu0 %v1556_v4  ;;  %1640 = vmatmul.mubr.bf16.vlgmr.msra.gmra.mrb[44].mxu1 %v1556_v4 }
 0x88c   :  { %v1600_v50 = vpop.f32.mrb[44].mxu0  ;;  %v1641_v5 = vpop.f32.mrb[44].mxu1 }
 0x88d   :  { %v1648_v36 = vadd.f32 %v1600_v50, %v3045_v51  ;;  %v1650_v52 = vadd.f32 %v1641_v5, %v3046_v37  ;;  %v1602_v54 = vpop.f32.mrb[45].mxu0  ;;  %v1643_v55 = vpop.f32.mrb[45].mxu1 }
 0x88e   :  { %v1649_v57 = vadd.f32 %v1602_v54, %v3047_v56  ;;  %v1651_v59 = vadd.f32 %v1643_v55, %v3048_v58  ;;  %v1604_v9 = vpop.f32.mrb[46].mxu0  ;;  %v1645_v17 = vpop.f32.mrb[46].mxu1 }
 0x88f   :  { %v1825_v19 = vmul.f32 -1.442695, %v1648_v36  ;;  %v1605_v18 = vpop.f32.mrb[47].mxu0  ;;  %v1646_v20 = vpop.f32.mrb[47].mxu1 }
 0x890   :  { %v1826_v0 = vmul.f32 -1.442695, %v1649_v57  ;;  %v1827_v21 = vmul.f32 -1.442695, %v1651_v59 }
 0x891   :  { %2053 = vpow2.f32 %v1825_v19 }
 0x892   :  { %2055 = vpow2.f32 %v1826_v0 }
 0x893   :  { %2057 = vpow2.f32 %v1827_v21 }
 0x894   :  { %2059 = vtanh.f32 %v1650_v52 }
 0x89b   :  { %v2054_v22 = vpop.eup %2053 }
 0x89c   :  { %v2056_v28 = vpop.eup %2055  ;;  %v1655_v14 = vadd.f32 1.0, %v2054_v22 }
 0x89d   :  { %v1661_v10 = vadd.f32 1.0, %v2056_v28  ;;  %v2058_v62 = vpop.eup %2057 }
 0x89e   :  { %2061 = vrcp.f32 %v1655_v14  ;;  %v2060_v25 = vpop.eup %2059  ;;  %v1668_v33 = vadd.f32 1.0, %v2058_v62 }
 0x89f   :  { %2063 = vrcp.f32 %v1661_v10 }
 0x8a0   :  { %2065 = vrcp.f32 %v1668_v33 }
 0x8a8   :  { %v2062_v27 = vpop.eup %2061 }
 0x8a9   :  { %v2064_v29 = vpop.eup %2063  ;;  %v1672_v26 = vmul.f32 %v2062_v27, %v2060_v25 }
 0x8aa   :  { %v1671_v34 = vmul.f32 %v2064_v29, %v1553_v2  ;;  %v2066_v53 = vpop.eup %2065 }
 0x8ac   :  { %v1673_v35 = vadd.f32 %v1672_v26, %v1671_v34 }
 0x8ae   :  { %2067 = vtanh.f32 %v1673_v35  ;;  %1682 = vst [vmem:[#allocation17] sm:$0xff] %v1673_v35 }
 0x8b8   :  { %v2068_v6 = vpop.eup %2067 }
 0x8b9   :  { %v1675_v30 = vmul.f32 %v2068_v6, %v2066_v53 }
 0x8bb   :  { %v1676_v8 = vpack.c.bf16 %v1675_v30, %v1675_v30  ;;  %1681 = vst [vmem:[#allocation15] sm:$0xff] %v1675_v30 }
 0x8bc   :  { %2222 = shalt.err (!%p2219_p2)
}
 0x8bd   :  { %s2223_s11 = scalar_lea.hbm %s3002_s7, 128 }
 0x8be   :  { %p2224_p3 = scmp.ne.s32.totalorder %s3002_s7, %s2223_s11  ;;  %p2227_p4 = scmp.lt.u32.totalorder %s2223_s11, %s3002_s7 }
 0x8c0   :  { %p2229_p5 = pnand %p2227_p4, %p2224_p3 }
 0x8c2   :  { %2232 = shalt.err (!%p2229_p5)
}
 0x8c3   :  { %1704 = dma.vmem_to_hbm [thread:$0]  %s1702_s27, 128, %s3002_s7, [#allocation16]   ;;  %1678 = vst [vmem:[#allocation14 + $0x1c] sm:$0xf] %v1676_v8 }
 0x8c4   :  { %s2233_s16 = scalar_lea.vmem %s2942_s24, 128  ;;  %p2238_p7 = scmp.lt.s32.totalorder %s2942_s24, %s2942_s24 }
 0x8c5   :  { %p2234_p6 = scmp.ne.s32.totalorder %s2942_s24, %s2233_s16  ;;  %p2239_p8 = scmp.lt.s32.totalorder %s2233_s16, %s2233_s16 }
 0x8c7   :  { %p2240_p9 = por %p2239_p8, %p2238_p7 }
 0x8c9   :  { %p2241_p10 = pnand %p2240_p9, %p2234_p6 }
 0x8cb   :  { %2244 = shalt.err (!%p2241_p10)
}
 0x8cc   :  { %s2245_s19 = scalar_lea.hbm %s3003_s8, 128 }
 0x8cd   :  { %p2246_p11 = scmp.ne.s32.totalorder %s3003_s8, %s2245_s19  ;;  %p2249_p12 = scmp.lt.u32.totalorder %s2245_s19, %s3003_s8 }
 0x8cf   :  { %p2251_p13 = pnand %p2249_p12, %p2246_p11 }
 0x8d1   :  { %2254 = shalt.err (!%p2251_p13)
}
 0x8d2   :  { %1714 = dma.vmem_to_hbm [thread:$0]  %s2942_s24, 128, %s3003_s8, [#allocation16]  }
 0x8d3   :  { %s2255_s1 = scalar_lea.vmem %s2944_s26, 512  ;;  %p2260_p1 = scmp.lt.s32.totalorder %s2944_s26, %s2944_s26 }
 0x8d4   :  { %p2256_p0 = scmp.ne.s32.totalorder %s2944_s26, %s2255_s1  ;;  %p2261_p2 = scmp.lt.s32.totalorder %s2255_s1, %s2255_s1 }
 0x8d6   :  { %p2262_p3 = por %p2261_p2, %p2260_p1 }
 0x8d8   :  { %p2263_p4 = pnand %p2262_p3, %p2256_p0 }
 0x8da   :  { %2266 = shalt.err (!%p2263_p4)
}
 0x8db   :  { %s2267_s23 = scalar_lea.hbm %s3001_s6, 512 }
 0x8dc   :  { %p2268_p5 = scmp.ne.s32.totalorder %s3001_s6, %s2267_s23  ;;  %p2271_p6 = scmp.lt.u32.totalorder %s2267_s23, %s3001_s6 }
 0x8de   :  { %p2273_p7 = pnand %p2271_p6, %p2268_p5 }
 0x8e0   :  { %2276 = shalt.err (!%p2273_p7)
}
 0x8e1   :  { %1694 = dma.vmem_to_hbm [thread:$0]  %s2944_s26, 512, %s3001_s6, [#allocation7], %s2292_s3, %s2292_s3, %s2293_s30  }
 0x8e2   :  { %2283 = dma.done.wait [#allocation7], 512  }
 0x8e3   :  { %2284 = vsyncadd [#allocation7], 4294966784 }
 0x8e4   :  { %2285 = dma.done.wait [#allocation16], 256  }
 0x8e5   :  { %2286 = vsyncadd [#allocation16], 4294967040 }
 0x8e6   :  { %1724 = vsyncpa [#allocation6], 1 }
 0x8e7   :  { %1725 = vsyncpa [#allocation9], 1 }
 0x8e8   :  { %1726 = vsyncpa [#allocation12], 1 }
 0x8e9   :  { %1727 = vsyncpa [#allocation7], 1 }
 0x8ea   :  { %1728 = vsyncpa [#allocation16], 1 }

</bundles_post_ra>
